<compile_context>
chip_gen: v7x
topology: tpu7x:2x2x1
jax: 0.10.0
libtpu: 0.0.40
codegen_flags: <defaults>
</compile_context>

<pallas_src>
import functools

import jax
import jax.numpy as jnp
from jax.experimental import pallas as pl
from jax.experimental.pallas import tpu as pltpu

USE_RNN = True


def _round_up(n, m):
    return ((n + m - 1) // m) * m


# ----------------------------------------------------------------------------
# Kernel 1: the FULL bidirectional multi-layer tanh-RNN stack.
#
# Layout: time-major flat 2-D slabs, row (t*Bp + b) <-> (t, b), lane-padded.
#   x_ref      : (S*Bp, in_pad)                zero-padded input slab
#   wih_ref    : (L, in_pad, rec) bf16         [W_ih_fwd | W_ih_bwd], lane-padded
#   whh_ref    : (L, rec, rec)    f32          block-diag [W_hh_fwd, W_hh_bwd]
#   b_ref      : (L, 1, rec)      f32          [b_fwd | b_bwd] (b_ih + b_hh)
#   out_ref    : (S*Bp, in_pad)                [:, :H] fwd hidden, [:, H:2H] bwd
#   xw_scr     : (S*Bp, rec)      f32          per-layer projected inputs
#
#   h_t = tanh(x_t @ W_ih + h_{t-1} @ W_hh + b),   h_0 = 0
# ----------------------------------------------------------------------------
def _rnn_stack_kernel(x_ref, wih_ref, whh_ref, b_ref, out_ref, xw_scr,
                      *, seq_len, bp, hidden, num_layers):
    two_h = 2 * hidden
    sb = seq_len * bp
    in_pad = out_ref.shape[1]
    rec = xw_scr.shape[1]

    # Zero the padded lanes of the activation slab once: later layers and the
    # FC head read these columns (against zero weight rows) -> keep them 0.
    if in_pad > two_h:
        out_ref[:, two_h:] = jnp.zeros((sb, in_pad - two_h), jnp.float32)

    for layer in range(num_layers):
        src_ref = x_ref if layer == 0 else out_ref
        x = src_ref[...]                                       # (S*Bp, in_pad)

        # Hoisted input projection: ONE bf16 MXU matmul per layer covering
        # both directions; f32 accumulation, f32 bias add.
        xw = jnp.dot(x.astype(jnp.bfloat16), wih_ref[layer],
                     preferred_element_type=jnp.float32) + b_ref[layer]

        # Assemble per-step inputs: forward half in time order, backward half
        # time-reversed, so the serial loop does ONE contiguous lane-dense
        # (Bp, rec) load per step (reversal cost is off the critical path).
        xw_scr[...] = xw
        for t in range(seq_len):
            dst = t * bp
            src = (seq_len - 1 - t) * bp
            xw_scr[dst:dst + bp, hidden:two_h] = xw[src:src + bp, hidden:two_h]

        whh = whh_ref[layer]                                   # (rec, rec) f32

        # Serial recurrence: fwd & bwd fused into a single block-diagonal
        # matmul per step; carried state kept in f32 (no bf16 drift).
        h = jnp.zeros((bp, rec), jnp.float32)
        # TODO(synk): lax.fori_loop(..., unroll=2-4) once S grows beyond ~32.
        for t in range(seq_len):
            rf = t * bp
            rb = (seq_len - 1 - t) * bp
            h = jnp.tanh(xw_scr[rf:rf + bp, :]
                         + jnp.dot(h, whh, preferred_element_type=jnp.float32))
            out_ref[rf:rf + bp, 0:hidden] = h[:, 0:hidden]
            out_ref[rb:rb + bp, hidden:two_h] = h[:, hidden:two_h]


def rnn_stack(x2d, wih_stack, whh_stack, b_stack, *, seq_len, bp, hidden,
              num_layers):
    """x2d: (S*Bp, in_pad). Returns (S*Bp, in_pad); cols [:2H] are the output."""
    sb, in_pad = x2d.shape
    rec = whh_stack.shape[-1]
    vmem = pl.BlockSpec(memory_space=pltpu.MemorySpace.VMEM)
    kernel = functools.partial(_rnn_stack_kernel, seq_len=seq_len, bp=bp,
                               hidden=hidden, num_layers=num_layers)
    resident_bytes = (sb * in_pad * 4          # input slab
                      + sb * in_pad * 4        # output slab
                      + sb * rec * 4           # projection scratch
                      + wih_stack.size * 2 + whh_stack.size * 4
                      + b_stack.size * 4)
    vmem_limit = int(min(max(2 * resident_bytes + (4 << 20), 32 << 20), 64 << 20))
    return pl.pallas_call(
        kernel,
        out_shape=jax.ShapeDtypeStruct((sb, in_pad), jnp.float32),
        in_specs=[vmem] * 4,
        out_specs=vmem,
        scratch_shapes=[pltpu.VMEM((sb, rec), jnp.float32)],
        compiler_params=pltpu.CompilerParams(vmem_limit_bytes=vmem_limit),
    )(x2d, wih_stack, whh_stack, b_stack)


# ----------------------------------------------------------------------------
# Kernel 2: FC head (Linear/ReLU x3 + Linear) + sigmoid param scaling.
# Row-tiled grid; weights stay VMEM-resident (constant index_map); bf16 MXU
# operands with f32 accumulation; 128-lane padded output slab.
#   out = min + (max - min) * sigmoid(z),  sigmoid(z) = 0.5*(tanh(z/2)+1)
# ----------------------------------------------------------------------------
def _fc_scale_kernel(x_ref, w1, b1, w2, b2, w3, b3, w4, b4, mn, sc, out_ref):
    h = jnp.maximum(
        jnp.dot(x_ref[...].astype(jnp.bfloat16), w1[...],
                preferred_element_type=jnp.float32) + b1[...], 0.0)
    h = jnp.maximum(
        jnp.dot(h.astype(jnp.bfloat16), w2[...],
                preferred_element_type=jnp.float32) + b2[...], 0.0)
    h = jnp.maximum(
        jnp.dot(h.astype(jnp.bfloat16), w3[...],
                preferred_element_type=jnp.float32) + b3[...], 0.0)
    z = jnp.dot(h.astype(jnp.bfloat16), w4[...],
                preferred_element_type=jnp.float32) + b4[...]
    s = 0.5 * (jnp.tanh(0.5 * z) + 1.0)          # stable sigmoid (no exp/inf)
    out_ref[...] = mn[...] + sc[...] * s


def fc_scale(x_flat, fc_params, min_values, max_values, *, tile_rows=1024):
    """x_flat: (N, d_in) with d_in a 128 multiple. Returns (N, P)."""
    n_rows, d_in = x_flat.shape
    (w1, b1), (w2, b2), (w3, b3), (w4, b4) = fc_params
    p = w4.shape[1]
    p_pad = _round_up(max(p, 128), 128)          # lane-dense output slab

    # Pad w1 rows to the lane-padded input width (padded input cols are zero).
    if w1.shape[0] != d_in:
        w1 = jnp.zeros((d_in, w1.shape[1]), jnp.float32).at[:w1.shape[0]].set(w1)
    # Zero-pad the final linear layer + scaling constants to p_pad columns.
    w4p = jnp.zeros((w4.shape[0], p_pad), jnp.float32).at[:, :p].set(w4)
    b4p = jnp.zeros((1, p_pad), jnp.float32).at[:, :p].set(b4.reshape(1, -1))
    mn = jnp.zeros((1, p_pad), jnp.float32).at[:, :p].set(min_values.reshape(1, -1))
    sc = jnp.zeros((1, p_pad), jnp.float32).at[:, :p].set(
        (max_values - min_values).reshape(1, -1))

    # Row tiling: multiple of 8 sublanes; pad N so the grid divides evenly.
    tile = _round_up(n_rows, 8) if n_rows <= tile_rows else tile_rows
    n_pad = _round_up(n_rows, tile)
    xp = x_flat if n_pad == n_rows else jnp.pad(x_flat, ((0, n_pad - n_rows), (0, 0)))

    row_spec = pl.BlockSpec((tile, d_in), lambda i: (i, 0))
    out_spec = pl.BlockSpec((tile, p_pad), lambda i: (i, 0))

    def resident(a):                             # fetched once, stays in VMEM
        return pl.BlockSpec(a.shape, lambda i: (0, 0))

    weights = [w1.astype(jnp.bfloat16), b1.reshape(1, -1),
               w2.astype(jnp.bfloat16), b2.reshape(1, -1),
               w3.astype(jnp.bfloat16), b3.reshape(1, -1),
               w4p.astype(jnp.bfloat16), b4p, mn, sc]

    y = pl.pallas_call(
        _fc_scale_kernel,
        out_shape=jax.ShapeDtypeStruct((n_pad, p_pad), jnp.float32),
        grid=(n_pad // tile,),
        in_specs=[row_spec] + [resident(a) for a in weights],
        out_specs=out_spec,
        compiler_params=pltpu.CompilerParams(dimension_semantics=("parallel",)),
    )(xp, *weights)
    return y[:n_rows, :p]


# ----------------------------------------------------------------------------
# Parameter construction (deterministic, mirrors the module's __init__ shapes).
# Weight matrices are stored (in_features, out_features): kernels compute x @ W.
# ----------------------------------------------------------------------------
def xavier_uniform(key, shape):
    fan_in, fan_out = shape
    limit = jnp.sqrt(6.0 / (fan_in + fan_out))
    return jax.random.uniform(key, shape, jnp.float32, -limit, limit)


def linear_init(key, fan_in, fan_out):
    kw, kb = jax.random.split(key)
    bound = 1.0 / jnp.sqrt(jnp.float32(fan_in))
    w = jax.random.uniform(kw, (fan_in, fan_out), jnp.float32, -bound, bound)
    b = jax.random.uniform(kb, (fan_out,), jnp.float32, -bound, bound)
    return w, b


def make_params(key, input_size, hidden_size, num_layers, n_out):
    rnn_layers = []
    for layer in range(num_layers):
        f_in = input_size if layer == 0 else 2 * hidden_size
        layer_weights = []
        for _direction in range(2):                       # forward, backward
            key, k1, k2, k3, k4 = jax.random.split(key, 5)
            w_ih = xavier_uniform(k1, (f_in, hidden_size))        # xavier (module)
            w_hh = xavier_uniform(k2, (hidden_size, hidden_size))
            bound = 1.0 / jnp.sqrt(jnp.float32(hidden_size))
            b_ih = jax.random.uniform(k3, (hidden_size,), jnp.float32, -bound, bound)
            b_hh = jax.random.uniform(k4, (hidden_size,), jnp.float32, -bound, bound)
            layer_weights.append((w_ih, w_hh, (b_ih + b_hh).reshape(1, hidden_size)))
        rnn_layers.append(tuple(layer_weights))

    fc_dims = [2 * hidden_size, hidden_size, hidden_size // 2, hidden_size // 4, n_out]
    fc_params = []
    for i in range(4):
        key, sub = jax.random.split(key)
        fc_params.append(linear_init(sub, fc_dims[i], fc_dims[i + 1]))
    return rnn_layers, fc_params


# ----------------------------------------------------------------------------
# Full forward: bidirectional multi-layer RNN -> FC -> sigmoid scale.
#   x: (B, S, input_size) batch_first, like the PyTorch module.
# ----------------------------------------------------------------------------
@jax.jit
def temporal_nn_forward(x, rnn_layers, fc_params, min_values, max_values):
    batch, seq, feat = x.shape
    hidden = rnn_layers[0][0][1].shape[0]
    num_layers = len(rnn_layers)
    two_h = 2 * hidden

    bp = _round_up(max(batch, 8), 8)                    # sublane-aligned batch
    in_pad = _round_up(max(feat, two_h), 128)           # lane-dense slab width
    rec = _round_up(two_h, 128)                         # recurrence lane width

    # Pack / pad / stack the RNN weights (uniform shapes across layers).
    wih_list, whh_list, b_list = [], [], []
    for (wih_f, whh_f, b_f), (wih_b, whh_b, b_b) in rnn_layers:
        f_in = wih_f.shape[0]
        wih = (jnp.zeros((in_pad, rec), jnp.float32)
               .at[:f_in, :hidden].set(wih_f)
               .at[:f_in, hidden:two_h].set(wih_b))
        whh = (jnp.zeros((rec, rec), jnp.float32)        # block-diag fwd/bwd
               .at[:hidden, :hidden].set(whh_f)
               .at[hidden:two_h, hidden:two_h].set(whh_b))
        b = (jnp.zeros((1, rec), jnp.float32)
             .at[:, :hidden].set(b_f)
             .at[:, hidden:two_h].set(b_b))
        wih_list.append(wih.astype(jnp.bfloat16))
        whh_list.append(whh)
        b_list.append(b)
    wih_stack = jnp.stack(wih_list)                      # (L, in_pad, rec) bf16
    whh_stack = jnp.stack(whh_list)                      # (L, rec, rec)    f32
    b_stack = jnp.stack(b_list)                          # (L, 1, rec)      f32

    # Time-major flat padded input slab (row = t*Bp + b).
    xt = jnp.transpose(x.astype(jnp.float32), (1, 0, 2))            # (S, B, F)
    xt = jnp.pad(xt, ((0, 0), (0, bp - batch), (0, in_pad - feat)))
    x2d = xt.reshape(seq * bp, in_pad)

    h = rnn_stack(x2d, wih_stack, whh_stack, b_stack, seq_len=seq, bp=bp,
                  hidden=hidden, num_layers=num_layers)              # (S*Bp, in_pad)

    y = fc_scale(h, fc_params, min_values, max_values)               # (S*Bp, P)
    y = y.reshape(seq, bp, -1)[:, :batch, :]
    return jnp.transpose(y, (1, 0, 2))                               # (B, S, P)


if __name__ == "__main__":
    # Small shapes consistent with the module's forward semantics.
    batch, seq, input_size = 2, 8, 1
    hidden_size, num_layers = 32, 2
    params = {
        "learnable_param_order": ["p0", "p1", "p2", "p3"],
        "learnable_param_default": [0.5, 1.0, 0.0, 1.0],
        "param_min": [0.0, 1.0, -1.0, 0.5],
        "param_max": [1.0, 2.0, 1.0, 1.5],
    }
    n_out = len(params["learnable_param_order"])

    key = jax.random.PRNGKey(0)
    key, kx, kp = jax.random.split(key, 3)
    x = jax.random.normal(kx, (batch, seq, input_size), jnp.float32)
    rnn_layers, fc_params = make_params(kp, input_size, hidden_size, num_layers, n_out)
    min_values = jnp.asarray(params["param_min"], jnp.float32)
    max_values = jnp.asarray(params["param_max"], jnp.float32)

    y = temporal_nn_forward(x, rnn_layers, fc_params, min_values, max_values)
    y = jax.block_until_ready(y)

    assert y.shape == (batch, seq, n_out)
    assert bool(jnp.all(jnp.isfinite(y)))
    assert bool(jnp.all(y >= min_values - 1e-5)) and bool(jnp.all(y <= max_values + 1e-5))
    print("KERNEL_OK")
</pallas_src>

<mosaic_0001>
module attributes {stable_mosaic.version = 11 : i64} {
  func.func @_rnn_stack_kernel(%arg0: memref<64x128xf32, #tpu.memory_space<vmem>>, %arg1: memref<2x128x128xbf16, #tpu.memory_space<vmem>>, %arg2: memref<2x128x128xf32, #tpu.memory_space<vmem>>, %arg3: memref<2x1x128xf32, #tpu.memory_space<vmem>>, %arg4: memref<64x128xf32, #tpu.memory_space<vmem>>, %arg5: memref<64x128xf32, #tpu.memory_space<vmem>>) attributes {dimension_semantics = [], scalar_prefetch = 0 : i64, scratch_operands = 1 : i64, tpu.core_type = #tpu.core_type<tc>} {
    %cst = arith.constant 0.000000e+00 : f32
    %0 = vector.broadcast %cst : f32 to vector<64x64xf32>
    %c0 = arith.constant 0 : index
    %c64 = arith.constant 64 : index
    %1 = vector.load %arg4[%c0, %c64] : memref<64x128xf32, #tpu.memory_space<vmem>>, vector<64x64xf32>
    tpu.vector_store %arg4[%c0, %c64], %0 {strides = array<i32>} : memref<64x128xf32, #tpu.memory_space<vmem>>, vector<64x64xf32>,
    %c0_0 = arith.constant 0 : index
    %c0_1 = arith.constant 0 : index
    %2 = vector.load %arg0[%c0_0, %c0_1] : memref<64x128xf32, #tpu.memory_space<vmem>>, vector<64x128xf32>
    %3 = arith.truncf %2 : vector<64x128xf32> to vector<64x128xbf16>
    %c0_2 = arith.constant 0 : index
    %c0_3 = arith.constant 0 : index
    %c0_4 = arith.constant 0 : index
    %4 = vector.load %arg1[%c0_2, %c0_3, %c0_4] : memref<2x128x128xbf16, #tpu.memory_space<vmem>>, vector<1x128x128xbf16>
    %5 = vector.shape_cast %4 : vector<1x128x128xbf16> to vector<128x128xbf16>
    %cst_5 = arith.constant dense<0.000000e+00> : vector<64x128xf32>
    %6 = tpu.matmul %3, %5, %cst_5 {dimension_numbers = #tpu.dot_dimension_numbers<[1], [0], [0], [1], [0, 0, 1, 1], [], []>} : vector<64x128xbf16>, vector<128x128xbf16>, vector<64x128xf32> -> vector<64x128xf32>
    %c0_6 = arith.constant 0 : index
    %c0_7 = arith.constant 0 : index
    %c0_8 = arith.constant 0 : index
    %7 = vector.load %arg3[%c0_6, %c0_7, %c0_8] : memref<2x1x128xf32, #tpu.memory_space<vmem>>, vector<1x1x128xf32>
    %8 = vector.shape_cast %7 : vector<1x1x128xf32> to vector<1x128xf32>
    %9 = vector.broadcast %8 : vector<1x128xf32> to vector<64x128xf32>
    %10 = arith.addf %6, %9 : vector<64x128xf32>
    %c0_9 = arith.constant 0 : index
    %c0_10 = arith.constant 0 : index
    %11 = vector.load %arg5[%c0_9, %c0_10] : memref<64x128xf32, #tpu.memory_space<vmem>>, vector<64x128xf32>
    tpu.vector_store %arg5[%c0_9, %c0_10], %10 {strides = array<i32>} : memref<64x128xf32, #tpu.memory_space<vmem>>, vector<64x128xf32>,
    %12 = vector.extract_strided_slice %10 {offsets = [56, 32], sizes = [8, 32], strides = [1, 1]} : vector<64x128xf32> to vector<8x32xf32>
    %c0_11 = arith.constant 0 : index
    %c32 = arith.constant 32 : index
    %13 = vector.load %arg5[%c0_11, %c32] : memref<64x128xf32, #tpu.memory_space<vmem>>, vector<8x32xf32>
    tpu.vector_store %arg5[%c0_11, %c32], %12 {strides = array<i32>} : memref<64x128xf32, #tpu.memory_space<vmem>>, vector<8x32xf32>,
    %14 = vector.extract_strided_slice %10 {offsets = [48, 32], sizes = [8, 32], strides = [1, 1]} : vector<64x128xf32> to vector<8x32xf32>
    %c8 = arith.constant 8 : index
    %c32_12 = arith.constant 32 : index
    %15 = vector.load %arg5[%c8, %c32_12] : memref<64x128xf32, #tpu.memory_space<vmem>>, vector<8x32xf32>
    tpu.vector_store %arg5[%c8, %c32_12], %14 {strides = array<i32>} : memref<64x128xf32, #tpu.memory_space<vmem>>, vector<8x32xf32>,
    %16 = vector.extract_strided_slice %10 {offsets = [40, 32], sizes = [8, 32], strides = [1, 1]} : vector<64x128xf32> to vector<8x32xf32>
    %c16 = arith.constant 16 : index
    %c32_13 = arith.constant 32 : index
    %17 = vector.load %arg5[%c16, %c32_13] : memref<64x128xf32, #tpu.memory_space<vmem>>, vector<8x32xf32>
    tpu.vector_store %arg5[%c16, %c32_13], %16 {strides = array<i32>} : memref<64x128xf32, #tpu.memory_space<vmem>>, vector<8x32xf32>,
    %18 = vector.extract_strided_slice %10 {offsets = [32, 32], sizes = [8, 32], strides = [1, 1]} : vector<64x128xf32> to vector<8x32xf32>
    %c24 = arith.constant 24 : index
    %c32_14 = arith.constant 32 : index
    %19 = vector.load %arg5[%c24, %c32_14] : memref<64x128xf32, #tpu.memory_space<vmem>>, vector<8x32xf32>
    tpu.vector_store %arg5[%c24, %c32_14], %18 {strides = array<i32>} : memref<64x128xf32, #tpu.memory_space<vmem>>, vector<8x32xf32>,
    %20 = vector.extract_strided_slice %10 {offsets = [24, 32], sizes = [8, 32], strides = [1, 1]} : vector<64x128xf32> to vector<8x32xf32>
    %c32_15 = arith.constant 32 : index
    %c32_16 = arith.constant 32 : index
    %21 = vector.load %arg5[%c32_15, %c32_16] : memref<64x128xf32, #tpu.memory_space<vmem>>, vector<8x32xf32>
    tpu.vector_store %arg5[%c32_15, %c32_16], %20 {strides = array<i32>} : memref<64x128xf32, #tpu.memory_space<vmem>>, vector<8x32xf32>,
    %22 = vector.extract_strided_slice %10 {offsets = [16, 32], sizes = [8, 32], strides = [1, 1]} : vector<64x128xf32> to vector<8x32xf32>
    %c40 = arith.constant 40 : index
    %c32_17 = arith.constant 32 : index
    %23 = vector.load %arg5[%c40, %c32_17] : memref<64x128xf32, #tpu.memory_space<vmem>>, vector<8x32xf32>
    tpu.vector_store %arg5[%c40, %c32_17], %22 {strides = array<i32>} : memref<64x128xf32, #tpu.memory_space<vmem>>, vector<8x32xf32>,
    %24 = vector.extract_strided_slice %10 {offsets = [8, 32], sizes = [8, 32], strides = [1, 1]} : vector<64x128xf32> to vector<8x32xf32>
    %c48 = arith.constant 48 : index
    %c32_18 = arith.constant 32 : index
    %25 = vector.load %arg5[%c48, %c32_18] : memref<64x128xf32, #tpu.memory_space<vmem>>, vector<8x32xf32>
    tpu.vector_store %arg5[%c48, %c32_18], %24 {strides = array<i32>} : memref<64x128xf32, #tpu.memory_space<vmem>>, vector<8x32xf32>,
    %26 = vector.extract_strided_slice %10 {offsets = [0, 32], sizes = [8, 32], strides = [1, 1]} : vector<64x128xf32> to vector<8x32xf32>
    %c56 = arith.constant 56 : index
    %c32_19 = arith.constant 32 : index
    %27 = vector.load %arg5[%c56, %c32_19] : memref<64x128xf32, #tpu.memory_space<vmem>>, vector<8x32xf32>
    tpu.vector_store %arg5[%c56, %c32_19], %26 {strides = array<i32>} : memref<64x128xf32, #tpu.memory_space<vmem>>, vector<8x32xf32>,
    %c0_20 = arith.constant 0 : index
    %c0_21 = arith.constant 0 : index
    %c0_22 = arith.constant 0 : index
    %28 = vector.load %arg2[%c0_20, %c0_21, %c0_22] : memref<2x128x128xf32, #tpu.memory_space<vmem>>, vector<1x128x128xf32>
    %29 = vector.shape_cast %28 : vector<1x128x128xf32> to vector<128x128xf32>
    %cst_23 = arith.constant 0.000000e+00 : f32
    %30 = vector.broadcast %cst_23 : f32 to vector<8x128xf32>
    %c0_24 = arith.constant 0 : index
    %c0_25 = arith.constant 0 : index
    %31 = vector.load %arg5[%c0_24, %c0_25] : memref<64x128xf32, #tpu.memory_space<vmem>>, vector<8x128xf32>
    %cst_26 = arith.constant dense<0.000000e+00> : vector<8x128xf32>
    %32 = tpu.matmul %30, %29, %cst_26 {dimension_numbers = #tpu.dot_dimension_numbers<[1], [0], [0], [1], [0, 0, 1, 1], [], []>} : vector<8x128xf32>, vector<128x128xf32>, vector<8x128xf32> -> vector<8x128xf32>
    %33 = arith.addf %31, %32 : vector<8x128xf32>
    %34 = math.tanh %33 : vector<8x128xf32>
    %35 = vector.extract_strided_slice %34 {offsets = [0, 0], sizes = [8, 32], strides = [1, 1]} : vector<8x128xf32> to vector<8x32xf32>
    %c0_27 = arith.constant 0 : index
    %c0_28 = arith.constant 0 : index
    %36 = vector.load %arg4[%c0_27, %c0_28] : memref<64x128xf32, #tpu.memory_space<vmem>>, vector<8x32xf32>
    tpu.vector_store %arg4[%c0_27, %c0_28], %35 {strides = array<i32>} : memref<64x128xf32, #tpu.memory_space<vmem>>, vector<8x32xf32>,
    %37 = vector.extract_strided_slice %34 {offsets = [0, 32], sizes = [8, 32], strides = [1, 1]} : vector<8x128xf32> to vector<8x32xf32>
    %c56_29 = arith.constant 56 : index
    %c32_30 = arith.constant 32 : index
    %38 = vector.load %arg4[%c56_29, %c32_30] : memref<64x128xf32, #tpu.memory_space<vmem>>, vector<8x32xf32>
    tpu.vector_store %arg4[%c56_29, %c32_30], %37 {strides = array<i32>} : memref<64x128xf32, #tpu.memory_space<vmem>>, vector<8x32xf32>,
    %c8_31 = arith.constant 8 : index
    %c0_32 = arith.constant 0 : index
    %39 = vector.load %arg5[%c8_31, %c0_32] : memref<64x128xf32, #tpu.memory_space<vmem>>, vector<8x128xf32>
    %cst_33 = arith.constant dense<0.000000e+00> : vector<8x128xf32>
    %40 = tpu.matmul %34, %29, %cst_33 {dimension_numbers = #tpu.dot_dimension_numbers<[1], [0], [0], [1], [0, 0, 1, 1], [], []>} : vector<8x128xf32>, vector<128x128xf32>, vector<8x128xf32> -> vector<8x128xf32>
    %41 = arith.addf %39, %40 : vector<8x128xf32>
    %42 = math.tanh %41 : vector<8x128xf32>
    %43 = vector.extract_strided_slice %42 {offsets = [0, 0], sizes = [8, 32], strides = [1, 1]} : vector<8x128xf32> to vector<8x32xf32>
    %c8_34 = arith.constant 8 : index
    %c0_35 = arith.constant 0 : index
    %44 = vector.load %arg4[%c8_34, %c0_35] : memref<64x128xf32, #tpu.memory_space<vmem>>, vector<8x32xf32>
    tpu.vector_store %arg4[%c8_34, %c0_35], %43 {strides = array<i32>} : memref<64x128xf32, #tpu.memory_space<vmem>>, vector<8x32xf32>,
    %45 = vector.extract_strided_slice %42 {offsets = [0, 32], sizes = [8, 32], strides = [1, 1]} : vector<8x128xf32> to vector<8x32xf32>
    %c48_36 = arith.constant 48 : index
    %c32_37 = arith.constant 32 : index
    %46 = vector.load %arg4[%c48_36, %c32_37] : memref<64x128xf32, #tpu.memory_space<vmem>>, vector<8x32xf32>
    tpu.vector_store %arg4[%c48_36, %c32_37], %45 {strides = array<i32>} : memref<64x128xf32, #tpu.memory_space<vmem>>, vector<8x32xf32>,
    %c16_38 = arith.constant 16 : index
    %c0_39 = arith.constant 0 : index
    %47 = vector.load %arg5[%c16_38, %c0_39] : memref<64x128xf32, #tpu.memory_space<vmem>>, vector<8x128xf32>
    %cst_40 = arith.constant dense<0.000000e+00> : vector<8x128xf32>
    %48 = tpu.matmul %42, %29, %cst_40 {dimension_numbers = #tpu.dot_dimension_numbers<[1], [0], [0], [1], [0, 0, 1, 1], [], []>} : vector<8x128xf32>, vector<128x128xf32>, vector<8x128xf32> -> vector<8x128xf32>
    %49 = arith.addf %47, %48 : vector<8x128xf32>
    %50 = math.tanh %49 : vector<8x128xf32>
    %51 = vector.extract_strided_slice %50 {offsets = [0, 0], sizes = [8, 32], strides = [1, 1]} : vector<8x128xf32> to vector<8x32xf32>
    %c16_41 = arith.constant 16 : index
    %c0_42 = arith.constant 0 : index
    %52 = vector.load %arg4[%c16_41, %c0_42] : memref<64x128xf32, #tpu.memory_space<vmem>>, vector<8x32xf32>
    tpu.vector_store %arg4[%c16_41, %c0_42], %51 {strides = array<i32>} : memref<64x128xf32, #tpu.memory_space<vmem>>, vector<8x32xf32>,
    %53 = vector.extract_strided_slice %50 {offsets = [0, 32], sizes = [8, 32], strides = [1, 1]} : vector<8x128xf32> to vector<8x32xf32>
    %c40_43 = arith.constant 40 : index
    %c32_44 = arith.constant 32 : index
    %54 = vector.load %arg4[%c40_43, %c32_44] : memref<64x128xf32, #tpu.memory_space<vmem>>, vector<8x32xf32>
    tpu.vector_store %arg4[%c40_43, %c32_44], %53 {strides = array<i32>} : memref<64x128xf32, #tpu.memory_space<vmem>>, vector<8x32xf32>,
    %c24_45 = arith.constant 24 : index
    %c0_46 = arith.constant 0 : index
    %55 = vector.load %arg5[%c24_45, %c0_46] : memref<64x128xf32, #tpu.memory_space<vmem>>, vector<8x128xf32>
    %cst_47 = arith.constant dense<0.000000e+00> : vector<8x128xf32>
    %56 = tpu.matmul %50, %29, %cst_47 {dimension_numbers = #tpu.dot_dimension_numbers<[1], [0], [0], [1], [0, 0, 1, 1], [], []>} : vector<8x128xf32>, vector<128x128xf32>, vector<8x128xf32> -> vector<8x128xf32>
    %57 = arith.addf %55, %56 : vector<8x128xf32>
    %58 = math.tanh %57 : vector<8x128xf32>
    %59 = vector.extract_strided_slice %58 {offsets = [0, 0], sizes = [8, 32], strides = [1, 1]} : vector<8x128xf32> to vector<8x32xf32>
    %c24_48 = arith.constant 24 : index
    %c0_49 = arith.constant 0 : index
    %60 = vector.load %arg4[%c24_48, %c0_49] : memref<64x128xf32, #tpu.memory_space<vmem>>, vector<8x32xf32>
    tpu.vector_store %arg4[%c24_48, %c0_49], %59 {strides = array<i32>} : memref<64x128xf32, #tpu.memory_space<vmem>>, vector<8x32xf32>,
    %61 = vector.extract_strided_slice %58 {offsets = [0, 32], sizes = [8, 32], strides = [1, 1]} : vector<8x128xf32> to vector<8x32xf32>
    %c32_50 = arith.constant 32 : index
    %c32_51 = arith.constant 32 : index
    %62 = vector.load %arg4[%c32_50, %c32_51] : memref<64x128xf32, #tpu.memory_space<vmem>>, vector<8x32xf32>
    tpu.vector_store %arg4[%c32_50, %c32_51], %61 {strides = array<i32>} : memref<64x128xf32, #tpu.memory_space<vmem>>, vector<8x32xf32>,
    %c32_52 = arith.constant 32 : index
    %c0_53 = arith.constant 0 : index
    %63 = vector.load %arg5[%c32_52, %c0_53] : memref<64x128xf32, #tpu.memory_space<vmem>>, vector<8x128xf32>
    %cst_54 = arith.constant dense<0.000000e+00> : vector<8x128xf32>
    %64 = tpu.matmul %58, %29, %cst_54 {dimension_numbers = #tpu.dot_dimension_numbers<[1], [0], [0], [1], [0, 0, 1, 1], [], []>} : vector<8x128xf32>, vector<128x128xf32>, vector<8x128xf32> -> vector<8x128xf32>
    %65 = arith.addf %63, %64 : vector<8x128xf32>
    %66 = math.tanh %65 : vector<8x128xf32>
    %67 = vector.extract_strided_slice %66 {offsets = [0, 0], sizes = [8, 32], strides = [1, 1]} : vector<8x128xf32> to vector<8x32xf32>
    %c32_55 = arith.constant 32 : index
    %c0_56 = arith.constant 0 : index
    %68 = vector.load %arg4[%c32_55, %c0_56] : memref<64x128xf32, #tpu.memory_space<vmem>>, vector<8x32xf32>
    tpu.vector_store %arg4[%c32_55, %c0_56], %67 {strides = array<i32>} : memref<64x128xf32, #tpu.memory_space<vmem>>, vector<8x32xf32>,
    %69 = vector.extract_strided_slice %66 {offsets = [0, 32], sizes = [8, 32], strides = [1, 1]} : vector<8x128xf32> to vector<8x32xf32>
    %c24_57 = arith.constant 24 : index
    %c32_58 = arith.constant 32 : index
    %70 = vector.load %arg4[%c24_57, %c32_58] : memref<64x128xf32, #tpu.memory_space<vmem>>, vector<8x32xf32>
    tpu.vector_store %arg4[%c24_57, %c32_58], %69 {strides = array<i32>} : memref<64x128xf32, #tpu.memory_space<vmem>>, vector<8x32xf32>,
    %c40_59 = arith.constant 40 : index
    %c0_60 = arith.constant 0 : index
    %71 = vector.load %arg5[%c40_59, %c0_60] : memref<64x128xf32, #tpu.memory_space<vmem>>, vector<8x128xf32>
    %cst_61 = arith.constant dense<0.000000e+00> : vector<8x128xf32>
    %72 = tpu.matmul %66, %29, %cst_61 {dimension_numbers = #tpu.dot_dimension_numbers<[1], [0], [0], [1], [0, 0, 1, 1], [], []>} : vector<8x128xf32>, vector<128x128xf32>, vector<8x128xf32> -> vector<8x128xf32>
    %73 = arith.addf %71, %72 : vector<8x128xf32>
    %74 = math.tanh %73 : vector<8x128xf32>
    %75 = vector.extract_strided_slice %74 {offsets = [0, 0], sizes = [8, 32], strides = [1, 1]} : vector<8x128xf32> to vector<8x32xf32>
    %c40_62 = arith.constant 40 : index
    %c0_63 = arith.constant 0 : index
    %76 = vector.load %arg4[%c40_62, %c0_63] : memref<64x128xf32, #tpu.memory_space<vmem>>, vector<8x32xf32>
    tpu.vector_store %arg4[%c40_62, %c0_63], %75 {strides = array<i32>} : memref<64x128xf32, #tpu.memory_space<vmem>>, vector<8x32xf32>,
    %77 = vector.extract_strided_slice %74 {offsets = [0, 32], sizes = [8, 32], strides = [1, 1]} : vector<8x128xf32> to vector<8x32xf32>
    %c16_64 = arith.constant 16 : index
    %c32_65 = arith.constant 32 : index
    %78 = vector.load %arg4[%c16_64, %c32_65] : memref<64x128xf32, #tpu.memory_space<vmem>>, vector<8x32xf32>
    tpu.vector_store %arg4[%c16_64, %c32_65], %77 {strides = array<i32>} : memref<64x128xf32, #tpu.memory_space<vmem>>, vector<8x32xf32>,
    %c48_66 = arith.constant 48 : index
    %c0_67 = arith.constant 0 : index
    %79 = vector.load %arg5[%c48_66, %c0_67] : memref<64x128xf32, #tpu.memory_space<vmem>>, vector<8x128xf32>
    %cst_68 = arith.constant dense<0.000000e+00> : vector<8x128xf32>
    %80 = tpu.matmul %74, %29, %cst_68 {dimension_numbers = #tpu.dot_dimension_numbers<[1], [0], [0], [1], [0, 0, 1, 1], [], []>} : vector<8x128xf32>, vector<128x128xf32>, vector<8x128xf32> -> vector<8x128xf32>
    %81 = arith.addf %79, %80 : vector<8x128xf32>
    %82 = math.tanh %81 : vector<8x128xf32>
    %83 = vector.extract_strided_slice %82 {offsets = [0, 0], sizes = [8, 32], strides = [1, 1]} : vector<8x128xf32> to vector<8x32xf32>
    %c48_69 = arith.constant 48 : index
    %c0_70 = arith.constant 0 : index
    %84 = vector.load %arg4[%c48_69, %c0_70] : memref<64x128xf32, #tpu.memory_space<vmem>>, vector<8x32xf32>
    tpu.vector_store %arg4[%c48_69, %c0_70], %83 {strides = array<i32>} : memref<64x128xf32, #tpu.memory_space<vmem>>, vector<8x32xf32>,
    %85 = vector.extract_strided_slice %82 {offsets = [0, 32], sizes = [8, 32], strides = [1, 1]} : vector<8x128xf32> to vector<8x32xf32>
    %c8_71 = arith.constant 8 : index
    %c32_72 = arith.constant 32 : index
    %86 = vector.load %arg4[%c8_71, %c32_72] : memref<64x128xf32, #tpu.memory_space<vmem>>, vector<8x32xf32>
    tpu.vector_store %arg4[%c8_71, %c32_72], %85 {strides = array<i32>} : memref<64x128xf32, #tpu.memory_space<vmem>>, vector<8x32xf32>,
    %c56_73 = arith.constant 56 : index
    %c0_74 = arith.constant 0 : index
    %87 = vector.load %arg5[%c56_73, %c0_74] : memref<64x128xf32, #tpu.memory_space<vmem>>, vector<8x128xf32>
    %cst_75 = arith.constant dense<0.000000e+00> : vector<8x128xf32>
    %88 = tpu.matmul %82, %29, %cst_75 {dimension_numbers = #tpu.dot_dimension_numbers<[1], [0], [0], [1], [0, 0, 1, 1], [], []>} : vector<8x128xf32>, vector<128x128xf32>, vector<8x128xf32> -> vector<8x128xf32>
    %89 = arith.addf %87, %88 : vector<8x128xf32>
    %90 = math.tanh %89 : vector<8x128xf32>
    %91 = vector.extract_strided_slice %90 {offsets = [0, 0], sizes = [8, 32], strides = [1, 1]} : vector<8x128xf32> to vector<8x32xf32>
    %c56_76 = arith.constant 56 : index
    %c0_77 = arith.constant 0 : index
    %92 = vector.load %arg4[%c56_76, %c0_77] : memref<64x128xf32, #tpu.memory_space<vmem>>, vector<8x32xf32>
    tpu.vector_store %arg4[%c56_76, %c0_77], %91 {strides = array<i32>} : memref<64x128xf32, #tpu.memory_space<vmem>>, vector<8x32xf32>,
    %93 = vector.extract_strided_slice %90 {offsets = [0, 32], sizes = [8, 32], strides = [1, 1]} : vector<8x128xf32> to vector<8x32xf32>
    %c0_78 = arith.constant 0 : index
    %c32_79 = arith.constant 32 : index
    %94 = vector.load %arg4[%c0_78, %c32_79] : memref<64x128xf32, #tpu.memory_space<vmem>>, vector<8x32xf32>
    tpu.vector_store %arg4[%c0_78, %c32_79], %93 {strides = array<i32>} : memref<64x128xf32, #tpu.memory_space<vmem>>, vector<8x32xf32>,
    %c0_80 = arith.constant 0 : index
    %c0_81 = arith.constant 0 : index
    %95 = vector.load %arg4[%c0_80, %c0_81] : memref<64x128xf32, #tpu.memory_space<vmem>>, vector<64x128xf32>
    %96 = arith.truncf %95 : vector<64x128xf32> to vector<64x128xbf16>
    %c1 = arith.constant 1 : index
    %c0_82 = arith.constant 0 : index
    %c0_83 = arith.constant 0 : index
    %97 = vector.load %arg1[%c1, %c0_82, %c0_83] : memref<2x128x128xbf16, #tpu.memory_space<vmem>>, vector<1x128x128xbf16>
    %98 = vector.shape_cast %97 : vector<1x128x128xbf16> to vector<128x128xbf16>
    %cst_84 = arith.constant dense<0.000000e+00> : vector<64x128xf32>
    %99 = tpu.matmul %96, %98, %cst_84 {dimension_numbers = #tpu.dot_dimension_numbers<[1], [0], [0], [1], [0, 0, 1, 1], [], []>} : vector<64x128xbf16>, vector<128x128xbf16>, vector<64x128xf32> -> vector<64x128xf32>
    %c1_85 = arith.constant 1 : index
    %c0_86 = arith.constant 0 : index
    %c0_87 = arith.constant 0 : index
    %100 = vector.load %arg3[%c1_85, %c0_86, %c0_87] : memref<2x1x128xf32, #tpu.memory_space<vmem>>, vector<1x1x128xf32>
    %101 = vector.shape_cast %100 : vector<1x1x128xf32> to vector<1x128xf32>
    %102 = vector.broadcast %101 : vector<1x128xf32> to vector<64x128xf32>
    %103 = arith.addf %99, %102 : vector<64x128xf32>
    %c0_88 = arith.constant 0 : index
    %c0_89 = arith.constant 0 : index
    %104 = vector.load %arg5[%c0_88, %c0_89] : memref<64x128xf32, #tpu.memory_space<vmem>>, vector<64x128xf32>
    tpu.vector_store %arg5[%c0_88, %c0_89], %103 {strides = array<i32>} : memref<64x128xf32, #tpu.memory_space<vmem>>, vector<64x128xf32>,
    %105 = vector.extract_strided_slice %103 {offsets = [56, 32], sizes = [8, 32], strides = [1, 1]} : vector<64x128xf32> to vector<8x32xf32>
    %c0_90 = arith.constant 0 : index
    %c32_91 = arith.constant 32 : index
    %106 = vector.load %arg5[%c0_90, %c32_91] : memref<64x128xf32, #tpu.memory_space<vmem>>, vector<8x32xf32>
    tpu.vector_store %arg5[%c0_90, %c32_91], %105 {strides = array<i32>} : memref<64x128xf32, #tpu.memory_space<vmem>>, vector<8x32xf32>,
    %107 = vector.extract_strided_slice %103 {offsets = [48, 32], sizes = [8, 32], strides = [1, 1]} : vector<64x128xf32> to vector<8x32xf32>
    %c8_92 = arith.constant 8 : index
    %c32_93 = arith.constant 32 : index
    %108 = vector.load %arg5[%c8_92, %c32_93] : memref<64x128xf32, #tpu.memory_space<vmem>>, vector<8x32xf32>
    tpu.vector_store %arg5[%c8_92, %c32_93], %107 {strides = array<i32>} : memref<64x128xf32, #tpu.memory_space<vmem>>, vector<8x32xf32>,
    %109 = vector.extract_strided_slice %103 {offsets = [40, 32], sizes = [8, 32], strides = [1, 1]} : vector<64x128xf32> to vector<8x32xf32>
    %c16_94 = arith.constant 16 : index
    %c32_95 = arith.constant 32 : index
    %110 = vector.load %arg5[%c16_94, %c32_95] : memref<64x128xf32, #tpu.memory_space<vmem>>, vector<8x32xf32>
    tpu.vector_store %arg5[%c16_94, %c32_95], %109 {strides = array<i32>} : memref<64x128xf32, #tpu.memory_space<vmem>>, vector<8x32xf32>,
    %111 = vector.extract_strided_slice %103 {offsets = [32, 32], sizes = [8, 32], strides = [1, 1]} : vector<64x128xf32> to vector<8x32xf32>
    %c24_96 = arith.constant 24 : index
    %c32_97 = arith.constant 32 : index
    %112 = vector.load %arg5[%c24_96, %c32_97] : memref<64x128xf32, #tpu.memory_space<vmem>>, vector<8x32xf32>
    tpu.vector_store %arg5[%c24_96, %c32_97], %111 {strides = array<i32>} : memref<64x128xf32, #tpu.memory_space<vmem>>, vector<8x32xf32>,
    %113 = vector.extract_strided_slice %103 {offsets = [24, 32], sizes = [8, 32], strides = [1, 1]} : vector<64x128xf32> to vector<8x32xf32>
    %c32_98 = arith.constant 32 : index
    %c32_99 = arith.constant 32 : index
    %114 = vector.load %arg5[%c32_98, %c32_99] : memref<64x128xf32, #tpu.memory_space<vmem>>, vector<8x32xf32>
    tpu.vector_store %arg5[%c32_98, %c32_99], %113 {strides = array<i32>} : memref<64x128xf32, #tpu.memory_space<vmem>>, vector<8x32xf32>,
    %115 = vector.extract_strided_slice %103 {offsets = [16, 32], sizes = [8, 32], strides = [1, 1]} : vector<64x128xf32> to vector<8x32xf32>
    %c40_100 = arith.constant 40 : index
    %c32_101 = arith.constant 32 : index
    %116 = vector.load %arg5[%c40_100, %c32_101] : memref<64x128xf32, #tpu.memory_space<vmem>>, vector<8x32xf32>
    tpu.vector_store %arg5[%c40_100, %c32_101], %115 {strides = array<i32>} : memref<64x128xf32, #tpu.memory_space<vmem>>, vector<8x32xf32>,
    %117 = vector.extract_strided_slice %103 {offsets = [8, 32], sizes = [8, 32], strides = [1, 1]} : vector<64x128xf32> to vector<8x32xf32>
    %c48_102 = arith.constant 48 : index
    %c32_103 = arith.constant 32 : index
    %118 = vector.load %arg5[%c48_102, %c32_103] : memref<64x128xf32, #tpu.memory_space<vmem>>, vector<8x32xf32>
    tpu.vector_store %arg5[%c48_102, %c32_103], %117 {strides = array<i32>} : memref<64x128xf32, #tpu.memory_space<vmem>>, vector<8x32xf32>,
    %119 = vector.extract_strided_slice %103 {offsets = [0, 32], sizes = [8, 32], strides = [1, 1]} : vector<64x128xf32> to vector<8x32xf32>
    %c56_104 = arith.constant 56 : index
    %c32_105 = arith.constant 32 : index
    %120 = vector.load %arg5[%c56_104, %c32_105] : memref<64x128xf32, #tpu.memory_space<vmem>>, vector<8x32xf32>
    tpu.vector_store %arg5[%c56_104, %c32_105], %119 {strides = array<i32>} : memref<64x128xf32, #tpu.memory_space<vmem>>, vector<8x32xf32>,
    %c1_106 = arith.constant 1 : index
    %c0_107 = arith.constant 0 : index
    %c0_108 = arith.constant 0 : index
    %121 = vector.load %arg2[%c1_106, %c0_107, %c0_108] : memref<2x128x128xf32, #tpu.memory_space<vmem>>, vector<1x128x128xf32>
    %122 = vector.shape_cast %121 : vector<1x128x128xf32> to vector<128x128xf32>
    %cst_109 = arith.constant 0.000000e+00 : f32
    %123 = vector.broadcast %cst_109 : f32 to vector<8x128xf32>
    %c0_110 = arith.constant 0 : index
    %c0_111 = arith.constant 0 : index
    %124 = vector.load %arg5[%c0_110, %c0_111] : memref<64x128xf32, #tpu.memory_space<vmem>>, vector<8x128xf32>
    %cst_112 = arith.constant dense<0.000000e+00> : vector<8x128xf32>
    %125 = tpu.matmul %123, %122, %cst_112 {dimension_numbers = #tpu.dot_dimension_numbers<[1], [0], [0], [1], [0, 0, 1, 1], [], []>} : vector<8x128xf32>, vector<128x128xf32>, vector<8x128xf32> -> vector<8x128xf32>
    %126 = arith.addf %124, %125 : vector<8x128xf32>
    %127 = math.tanh %126 : vector<8x128xf32>
    %128 = vector.extract_strided_slice %127 {offsets = [0, 0], sizes = [8, 32], strides = [1, 1]} : vector<8x128xf32> to vector<8x32xf32>
    %c0_113 = arith.constant 0 : index
    %c0_114 = arith.constant 0 : index
    %129 = vector.load %arg4[%c0_113, %c0_114] : memref<64x128xf32, #tpu.memory_space<vmem>>, vector<8x32xf32>
    tpu.vector_store %arg4[%c0_113, %c0_114], %128 {strides = array<i32>} : memref<64x128xf32, #tpu.memory_space<vmem>>, vector<8x32xf32>,
    %130 = vector.extract_strided_slice %127 {offsets = [0, 32], sizes = [8, 32], strides = [1, 1]} : vector<8x128xf32> to vector<8x32xf32>
    %c56_115 = arith.constant 56 : index
    %c32_116 = arith.constant 32 : index
    %131 = vector.load %arg4[%c56_115, %c32_116] : memref<64x128xf32, #tpu.memory_space<vmem>>, vector<8x32xf32>
    tpu.vector_store %arg4[%c56_115, %c32_116], %130 {strides = array<i32>} : memref<64x128xf32, #tpu.memory_space<vmem>>, vector<8x32xf32>,
    %c8_117 = arith.constant 8 : index
    %c0_118 = arith.constant 0 : index
    %132 = vector.load %arg5[%c8_117, %c0_118] : memref<64x128xf32, #tpu.memory_space<vmem>>, vector<8x128xf32>
    %cst_119 = arith.constant dense<0.000000e+00> : vector<8x128xf32>
    %133 = tpu.matmul %127, %122, %cst_119 {dimension_numbers = #tpu.dot_dimension_numbers<[1], [0], [0], [1], [0, 0, 1, 1], [], []>} : vector<8x128xf32>, vector<128x128xf32>, vector<8x128xf32> -> vector<8x128xf32>
    %134 = arith.addf %132, %133 : vector<8x128xf32>
    %135 = math.tanh %134 : vector<8x128xf32>
    %136 = vector.extract_strided_slice %135 {offsets = [0, 0], sizes = [8, 32], strides = [1, 1]} : vector<8x128xf32> to vector<8x32xf32>
    %c8_120 = arith.constant 8 : index
    %c0_121 = arith.constant 0 : index
    %137 = vector.load %arg4[%c8_120, %c0_121] : memref<64x128xf32, #tpu.memory_space<vmem>>, vector<8x32xf32>
    tpu.vector_store %arg4[%c8_120, %c0_121], %136 {strides = array<i32>} : memref<64x128xf32, #tpu.memory_space<vmem>>, vector<8x32xf32>,
    %138 = vector.extract_strided_slice %135 {offsets = [0, 32], sizes = [8, 32], strides = [1, 1]} : vector<8x128xf32> to vector<8x32xf32>
    %c48_122 = arith.constant 48 : index
    %c32_123 = arith.constant 32 : index
    %139 = vector.load %arg4[%c48_122, %c32_123] : memref<64x128xf32, #tpu.memory_space<vmem>>, vector<8x32xf32>
    tpu.vector_store %arg4[%c48_122, %c32_123], %138 {strides = array<i32>} : memref<64x128xf32, #tpu.memory_space<vmem>>, vector<8x32xf32>,
    %c16_124 = arith.constant 16 : index
    %c0_125 = arith.constant 0 : index
    %140 = vector.load %arg5[%c16_124, %c0_125] : memref<64x128xf32, #tpu.memory_space<vmem>>, vector<8x128xf32>
    %cst_126 = arith.constant dense<0.000000e+00> : vector<8x128xf32>
    %141 = tpu.matmul %135, %122, %cst_126 {dimension_numbers = #tpu.dot_dimension_numbers<[1], [0], [0], [1], [0, 0, 1, 1], [], []>} : vector<8x128xf32>, vector<128x128xf32>, vector<8x128xf32> -> vector<8x128xf32>
    %142 = arith.addf %140, %141 : vector<8x128xf32>
    %143 = math.tanh %142 : vector<8x128xf32>
    %144 = vector.extract_strided_slice %143 {offsets = [0, 0], sizes = [8, 32], strides = [1, 1]} : vector<8x128xf32> to vector<8x32xf32>
    %c16_127 = arith.constant 16 : index
    %c0_128 = arith.constant 0 : index
    %145 = vector.load %arg4[%c16_127, %c0_128] : memref<64x128xf32, #tpu.memory_space<vmem>>, vector<8x32xf32>
    tpu.vector_store %arg4[%c16_127, %c0_128], %144 {strides = array<i32>} : memref<64x128xf32, #tpu.memory_space<vmem>>, vector<8x32xf32>,
    %146 = vector.extract_strided_slice %143 {offsets = [0, 32], sizes = [8, 32], strides = [1, 1]} : vector<8x128xf32> to vector<8x32xf32>
    %c40_129 = arith.constant 40 : index
    %c32_130 = arith.constant 32 : index
    %147 = vector.load %arg4[%c40_129, %c32_130] : memref<64x128xf32, #tpu.memory_space<vmem>>, vector<8x32xf32>
    tpu.vector_store %arg4[%c40_129, %c32_130], %146 {strides = array<i32>} : memref<64x128xf32, #tpu.memory_space<vmem>>, vector<8x32xf32>,
    %c24_131 = arith.constant 24 : index
    %c0_132 = arith.constant 0 : index
    %148 = vector.load %arg5[%c24_131, %c0_132] : memref<64x128xf32, #tpu.memory_space<vmem>>, vector<8x128xf32>
    %cst_133 = arith.constant dense<0.000000e+00> : vector<8x128xf32>
    %149 = tpu.matmul %143, %122, %cst_133 {dimension_numbers = #tpu.dot_dimension_numbers<[1], [0], [0], [1], [0, 0, 1, 1], [], []>} : vector<8x128xf32>, vector<128x128xf32>, vector<8x128xf32> -> vector<8x128xf32>
    %150 = arith.addf %148, %149 : vector<8x128xf32>
    %151 = math.tanh %150 : vector<8x128xf32>
    %152 = vector.extract_strided_slice %151 {offsets = [0, 0], sizes = [8, 32], strides = [1, 1]} : vector<8x128xf32> to vector<8x32xf32>
    %c24_134 = arith.constant 24 : index
    %c0_135 = arith.constant 0 : index
    %153 = vector.load %arg4[%c24_134, %c0_135] : memref<64x128xf32, #tpu.memory_space<vmem>>, vector<8x32xf32>
    tpu.vector_store %arg4[%c24_134, %c0_135], %152 {strides = array<i32>} : memref<64x128xf32, #tpu.memory_space<vmem>>, vector<8x32xf32>,
    %154 = vector.extract_strided_slice %151 {offsets = [0, 32], sizes = [8, 32], strides = [1, 1]} : vector<8x128xf32> to vector<8x32xf32>
    %c32_136 = arith.constant 32 : index
    %c32_137 = arith.constant 32 : index
    %155 = vector.load %arg4[%c32_136, %c32_137] : memref<64x128xf32, #tpu.memory_space<vmem>>, vector<8x32xf32>
    tpu.vector_store %arg4[%c32_136, %c32_137], %154 {strides = array<i32>} : memref<64x128xf32, #tpu.memory_space<vmem>>, vector<8x32xf32>,
    %c32_138 = arith.constant 32 : index
    %c0_139 = arith.constant 0 : index
    %156 = vector.load %arg5[%c32_138, %c0_139] : memref<64x128xf32, #tpu.memory_space<vmem>>, vector<8x128xf32>
    %cst_140 = arith.constant dense<0.000000e+00> : vector<8x128xf32>
    %157 = tpu.matmul %151, %122, %cst_140 {dimension_numbers = #tpu.dot_dimension_numbers<[1], [0], [0], [1], [0, 0, 1, 1], [], []>} : vector<8x128xf32>, vector<128x128xf32>, vector<8x128xf32> -> vector<8x128xf32>
    %158 = arith.addf %156, %157 : vector<8x128xf32>
    %159 = math.tanh %158 : vector<8x128xf32>
    %160 = vector.extract_strided_slice %159 {offsets = [0, 0], sizes = [8, 32], strides = [1, 1]} : vector<8x128xf32> to vector<8x32xf32>
    %c32_141 = arith.constant 32 : index
    %c0_142 = arith.constant 0 : index
    %161 = vector.load %arg4[%c32_141, %c0_142] : memref<64x128xf32, #tpu.memory_space<vmem>>, vector<8x32xf32>
    tpu.vector_store %arg4[%c32_141, %c0_142], %160 {strides = array<i32>} : memref<64x128xf32, #tpu.memory_space<vmem>>, vector<8x32xf32>,
    %162 = vector.extract_strided_slice %159 {offsets = [0, 32], sizes = [8, 32], strides = [1, 1]} : vector<8x128xf32> to vector<8x32xf32>
    %c24_143 = arith.constant 24 : index
    %c32_144 = arith.constant 32 : index
    %163 = vector.load %arg4[%c24_143, %c32_144] : memref<64x128xf32, #tpu.memory_space<vmem>>, vector<8x32xf32>
    tpu.vector_store %arg4[%c24_143, %c32_144], %162 {strides = array<i32>} : memref<64x128xf32, #tpu.memory_space<vmem>>, vector<8x32xf32>,
    %c40_145 = arith.constant 40 : index
    %c0_146 = arith.constant 0 : index
    %164 = vector.load %arg5[%c40_145, %c0_146] : memref<64x128xf32, #tpu.memory_space<vmem>>, vector<8x128xf32>
    %cst_147 = arith.constant dense<0.000000e+00> : vector<8x128xf32>
    %165 = tpu.matmul %159, %122, %cst_147 {dimension_numbers = #tpu.dot_dimension_numbers<[1], [0], [0], [1], [0, 0, 1, 1], [], []>} : vector<8x128xf32>, vector<128x128xf32>, vector<8x128xf32> -> vector<8x128xf32>
    %166 = arith.addf %164, %165 : vector<8x128xf32>
    %167 = math.tanh %166 : vector<8x128xf32>
    %168 = vector.extract_strided_slice %167 {offsets = [0, 0], sizes = [8, 32], strides = [1, 1]} : vector<8x128xf32> to vector<8x32xf32>
    %c40_148 = arith.constant 40 : index
    %c0_149 = arith.constant 0 : index
    %169 = vector.load %arg4[%c40_148, %c0_149] : memref<64x128xf32, #tpu.memory_space<vmem>>, vector<8x32xf32>
    tpu.vector_store %arg4[%c40_148, %c0_149], %168 {strides = array<i32>} : memref<64x128xf32, #tpu.memory_space<vmem>>, vector<8x32xf32>,
    %170 = vector.extract_strided_slice %167 {offsets = [0, 32], sizes = [8, 32], strides = [1, 1]} : vector<8x128xf32> to vector<8x32xf32>
    %c16_150 = arith.constant 16 : index
    %c32_151 = arith.constant 32 : index
    %171 = vector.load %arg4[%c16_150, %c32_151] : memref<64x128xf32, #tpu.memory_space<vmem>>, vector<8x32xf32>
    tpu.vector_store %arg4[%c16_150, %c32_151], %170 {strides = array<i32>} : memref<64x128xf32, #tpu.memory_space<vmem>>, vector<8x32xf32>,
    %c48_152 = arith.constant 48 : index
    %c0_153 = arith.constant 0 : index
    %172 = vector.load %arg5[%c48_152, %c0_153] : memref<64x128xf32, #tpu.memory_space<vmem>>, vector<8x128xf32>
    %cst_154 = arith.constant dense<0.000000e+00> : vector<8x128xf32>
    %173 = tpu.matmul %167, %122, %cst_154 {dimension_numbers = #tpu.dot_dimension_numbers<[1], [0], [0], [1], [0, 0, 1, 1], [], []>} : vector<8x128xf32>, vector<128x128xf32>, vector<8x128xf32> -> vector<8x128xf32>
    %174 = arith.addf %172, %173 : vector<8x128xf32>
    %175 = math.tanh %174 : vector<8x128xf32>
    %176 = vector.extract_strided_slice %175 {offsets = [0, 0], sizes = [8, 32], strides = [1, 1]} : vector<8x128xf32> to vector<8x32xf32>
    %c48_155 = arith.constant 48 : index
    %c0_156 = arith.constant 0 : index
    %177 = vector.load %arg4[%c48_155, %c0_156] : memref<64x128xf32, #tpu.memory_space<vmem>>, vector<8x32xf32>
    tpu.vector_store %arg4[%c48_155, %c0_156], %176 {strides = array<i32>} : memref<64x128xf32, #tpu.memory_space<vmem>>, vector<8x32xf32>,
    %178 = vector.extract_strided_slice %175 {offsets = [0, 32], sizes = [8, 32], strides = [1, 1]} : vector<8x128xf32> to vector<8x32xf32>
    %c8_157 = arith.constant 8 : index
    %c32_158 = arith.constant 32 : index
    %179 = vector.load %arg4[%c8_157, %c32_158] : memref<64x128xf32, #tpu.memory_space<vmem>>, vector<8x32xf32>
    tpu.vector_store %arg4[%c8_157, %c32_158], %178 {strides = array<i32>} : memref<64x128xf32, #tpu.memory_space<vmem>>, vector<8x32xf32>,
    %c56_159 = arith.constant 56 : index
    %c0_160 = arith.constant 0 : index
    %180 = vector.load %arg5[%c56_159, %c0_160] : memref<64x128xf32, #tpu.memory_space<vmem>>, vector<8x128xf32>
    %cst_161 = arith.constant dense<0.000000e+00> : vector<8x128xf32>
    %181 = tpu.matmul %175, %122, %cst_161 {dimension_numbers = #tpu.dot_dimension_numbers<[1], [0], [0], [1], [0, 0, 1, 1], [], []>} : vector<8x128xf32>, vector<128x128xf32>, vector<8x128xf32> -> vector<8x128xf32>
    %182 = arith.addf %180, %181 : vector<8x128xf32>
    %183 = math.tanh %182 : vector<8x128xf32>
    %184 = vector.extract_strided_slice %183 {offsets = [0, 0], sizes = [8, 32], strides = [1, 1]} : vector<8x128xf32> to vector<8x32xf32>
    %c56_162 = arith.constant 56 : index
    %c0_163 = arith.constant 0 : index
    %185 = vector.load %arg4[%c56_162, %c0_163] : memref<64x128xf32, #tpu.memory_space<vmem>>, vector<8x32xf32>
    tpu.vector_store %arg4[%c56_162, %c0_163], %184 {strides = array<i32>} : memref<64x128xf32, #tpu.memory_space<vmem>>, vector<8x32xf32>,
    %186 = vector.extract_strided_slice %183 {offsets = [0, 32], sizes = [8, 32], strides = [1, 1]} : vector<8x128xf32> to vector<8x32xf32>
    %c0_164 = arith.constant 0 : index
    %c32_165 = arith.constant 32 : index
    %187 = vector.load %arg4[%c0_164, %c32_165] : memref<64x128xf32, #tpu.memory_space<vmem>>, vector<8x32xf32>
    tpu.vector_store %arg4[%c0_164, %c32_165], %186 {strides = array<i32>} : memref<64x128xf32, #tpu.memory_space<vmem>>, vector<8x32xf32>,
    return
  }
}

module attributes {stable_mosaic.version = 11 : i64} {
  func.func @_fc_scale_kernel(%arg0: i32, %arg1: memref<64x128xf32, #tpu.memory_space<vmem>>, %arg2: memref<128x32xbf16, #tpu.memory_space<vmem>>, %arg3: memref<1x32xf32, #tpu.memory_space<vmem>>, %arg4: memref<32x16xbf16, #tpu.memory_space<vmem>>, %arg5: memref<1x16xf32, #tpu.memory_space<vmem>>, %arg6: memref<16x8xbf16, #tpu.memory_space<vmem>>, %arg7: memref<1x8xf32, #tpu.memory_space<vmem>>, %arg8: memref<8x128xbf16, #tpu.memory_space<vmem>>, %arg9: memref<1x128xf32, #tpu.memory_space<vmem>>, %arg10: memref<1x128xf32, #tpu.memory_space<vmem>>, %arg11: memref<1x128xf32, #tpu.memory_space<vmem>>, %arg12: memref<64x128xf32, #tpu.memory_space<vmem>>) attributes {dimension_semantics = [#tpu.dimension_semantics<parallel>], iteration_bounds = array<i64: 1>, scalar_prefetch = 0 : i64, scratch_operands = 0 : i64, tpu.core_type = #tpu.core_type<tc>, window_params = [{transform_indices = @transform_0, window_bounds = array<i64: 64, 128>}, {pipeline_mode = #tpu.pipeline_mode<synchronous>, transform_indices = @transform_1, window_bounds = array<i64: 128, 32>}, {pipeline_mode = #tpu.pipeline_mode<synchronous>, transform_indices = @transform_2, window_bounds = array<i64: 1, 32>}, {pipeline_mode = #tpu.pipeline_mode<synchronous>, transform_indices = @transform_3, window_bounds = array<i64: 32, 16>}, {pipeline_mode = #tpu.pipeline_mode<synchronous>, transform_indices = @transform_4, window_bounds = array<i64: 1, 16>}, {pipeline_mode = #tpu.pipeline_mode<synchronous>, transform_indices = @transform_5, window_bounds = array<i64: 16, 8>}, {pipeline_mode = #tpu.pipeline_mode<synchronous>, transform_indices = @transform_6, window_bounds = array<i64: 1, 8>}, {pipeline_mode = #tpu.pipeline_mode<synchronous>, transform_indices = @transform_7, window_bounds = array<i64: 8, 128>}, {pipeline_mode = #tpu.pipeline_mode<synchronous>, transform_indices = @transform_8, window_bounds = array<i64: 1, 128>}, {pipeline_mode = #tpu.pipeline_mode<synchronous>, transform_indices = @transform_9, window_bounds = array<i64: 1, 128>}, {pipeline_mode = #tpu.pipeline_mode<synchronous>, transform_indices = @transform_10, window_bounds = array<i64: 1, 128>}, {transform_indices = @transform_11, window_bounds = array<i64: 64, 128>}]} {
    %c0 = arith.constant 0 : index
    %c0_0 = arith.constant 0 : index
    %0 = vector.load %arg1[%c0, %c0_0] : memref<64x128xf32, #tpu.memory_space<vmem>>, vector<64x128xf32>
    %1 = arith.truncf %0 : vector<64x128xf32> to vector<64x128xbf16>
    %c0_1 = arith.constant 0 : index
    %c0_2 = arith.constant 0 : index
    %2 = vector.load %arg2[%c0_1, %c0_2] : memref<128x32xbf16, #tpu.memory_space<vmem>>, vector<128x32xbf16>
    %cst = arith.constant dense<0.000000e+00> : vector<64x32xf32>
    %3 = tpu.matmul %1, %2, %cst {dimension_numbers = #tpu.dot_dimension_numbers<[1], [0], [0], [1], [0, 0, 1, 1], [], []>} : vector<64x128xbf16>, vector<128x32xbf16>, vector<64x32xf32> -> vector<64x32xf32>
    %c0_3 = arith.constant 0 : index
    %c0_4 = arith.constant 0 : index
    %4 = vector.load %arg3[%c0_3, %c0_4] : memref<1x32xf32, #tpu.memory_space<vmem>>, vector<1x32xf32>
    %5 = vector.broadcast %4 : vector<1x32xf32> to vector<64x32xf32>
    %6 = arith.addf %3, %5 : vector<64x32xf32>
    %cst_5 = arith.constant 0.000000e+00 : f32
    %7 = vector.broadcast %cst_5 : f32 to vector<64x32xf32>
    %8 = arith.maximumf %6, %7 : vector<64x32xf32>
    %9 = arith.truncf %8 : vector<64x32xf32> to vector<64x32xbf16>
    %c0_6 = arith.constant 0 : index
    %c0_7 = arith.constant 0 : index
    %10 = vector.load %arg4[%c0_6, %c0_7] : memref<32x16xbf16, #tpu.memory_space<vmem>>, vector<32x16xbf16>
    %cst_8 = arith.constant dense<0.000000e+00> : vector<64x16xf32>
    %11 = tpu.matmul %9, %10, %cst_8 {dimension_numbers = #tpu.dot_dimension_numbers<[1], [0], [0], [1], [0, 0, 1, 1], [], []>} : vector<64x32xbf16>, vector<32x16xbf16>, vector<64x16xf32> -> vector<64x16xf32>
    %c0_9 = arith.constant 0 : index
    %c0_10 = arith.constant 0 : index
    %12 = vector.load %arg5[%c0_9, %c0_10] : memref<1x16xf32, #tpu.memory_space<vmem>>, vector<1x16xf32>
    %13 = vector.broadcast %12 : vector<1x16xf32> to vector<64x16xf32>
    %14 = arith.addf %11, %13 : vector<64x16xf32>
    %cst_11 = arith.constant 0.000000e+00 : f32
    %15 = vector.broadcast %cst_11 : f32 to vector<64x16xf32>
    %16 = arith.maximumf %14, %15 : vector<64x16xf32>
    %17 = arith.truncf %16 : vector<64x16xf32> to vector<64x16xbf16>
    %c0_12 = arith.constant 0 : index
    %c0_13 = arith.constant 0 : index
    %18 = vector.load %arg6[%c0_12, %c0_13] : memref<16x8xbf16, #tpu.memory_space<vmem>>, vector<16x8xbf16>
    %cst_14 = arith.constant dense<0.000000e+00> : vector<64x8xf32>
    %19 = tpu.matmul %17, %18, %cst_14 {dimension_numbers = #tpu.dot_dimension_numbers<[1], [0], [0], [1], [0, 0, 1, 1], [], []>} : vector<64x16xbf16>, vector<16x8xbf16>, vector<64x8xf32> -> vector<64x8xf32>
    %c0_15 = arith.constant 0 : index
    %c0_16 = arith.constant 0 : index
    %20 = vector.load %arg7[%c0_15, %c0_16] : memref<1x8xf32, #tpu.memory_space<vmem>>, vector<1x8xf32>
    %21 = vector.broadcast %20 : vector<1x8xf32> to vector<64x8xf32>
    %22 = arith.addf %19, %21 : vector<64x8xf32>
    %cst_17 = arith.constant 0.000000e+00 : f32
    %23 = vector.broadcast %cst_17 : f32 to vector<64x8xf32>
    %24 = arith.maximumf %22, %23 : vector<64x8xf32>
    %25 = arith.truncf %24 : vector<64x8xf32> to vector<64x8xbf16>
    %c0_18 = arith.constant 0 : index
    %c0_19 = arith.constant 0 : index
    %26 = vector.load %arg8[%c0_18, %c0_19] : memref<8x128xbf16, #tpu.memory_space<vmem>>, vector<8x128xbf16>
    %cst_20 = arith.constant dense<0.000000e+00> : vector<64x128xf32>
    %27 = tpu.matmul %25, %26, %cst_20 {dimension_numbers = #tpu.dot_dimension_numbers<[1], [0], [0], [1], [0, 0, 1, 1], [], []>} : vector<64x8xbf16>, vector<8x128xbf16>, vector<64x128xf32> -> vector<64x128xf32>
    %c0_21 = arith.constant 0 : index
    %c0_22 = arith.constant 0 : index
    %28 = vector.load %arg9[%c0_21, %c0_22] : memref<1x128xf32, #tpu.memory_space<vmem>>, vector<1x128xf32>
    %29 = vector.broadcast %28 : vector<1x128xf32> to vector<64x128xf32>
    %30 = arith.addf %27, %29 : vector<64x128xf32>
    %cst_23 = arith.constant 5.000000e-01 : f32
    %31 = vector.broadcast %cst_23 : f32 to vector<64x128xf32>
    %32 = arith.mulf %31, %30 : vector<64x128xf32>
    %33 = math.tanh %32 : vector<64x128xf32>
    %cst_24 = arith.constant 1.000000e+00 : f32
    %34 = vector.broadcast %cst_24 : f32 to vector<64x128xf32>
    %35 = arith.addf %33, %34 : vector<64x128xf32>
    %cst_25 = arith.constant 5.000000e-01 : f32
    %36 = vector.broadcast %cst_25 : f32 to vector<64x128xf32>
    %37 = arith.mulf %36, %35 : vector<64x128xf32>
    %c0_26 = arith.constant 0 : index
    %c0_27 = arith.constant 0 : index
    %38 = vector.load %arg10[%c0_26, %c0_27] : memref<1x128xf32, #tpu.memory_space<vmem>>, vector<1x128xf32>
    %c0_28 = arith.constant 0 : index
    %c0_29 = arith.constant 0 : index
    %39 = vector.load %arg11[%c0_28, %c0_29] : memref<1x128xf32, #tpu.memory_space<vmem>>, vector<1x128xf32>
    %40 = vector.broadcast %39 : vector<1x128xf32> to vector<64x128xf32>
    %41 = arith.mulf %40, %37 : vector<64x128xf32>
    %42 = vector.broadcast %38 : vector<1x128xf32> to vector<64x128xf32>
    %43 = arith.addf %42, %41 : vector<64x128xf32>
    %c0_30 = arith.constant 0 : index
    %c0_31 = arith.constant 0 : index
    %44 = vector.load %arg12[%c0_30, %c0_31] : memref<64x128xf32, #tpu.memory_space<vmem>>, vector<64x128xf32>
    tpu.vector_store %arg12[%c0_30, %c0_31], %43 {strides = array<i32>} : memref<64x128xf32, #tpu.memory_space<vmem>>, vector<64x128xf32>,
    return
  }
  func.func @transform_0(%arg0: i32) -> (i32, i32) {
    %c0_i32 = arith.constant 0 : i32
    %c0_i32_0 = arith.constant 0 : i32
    return %arg0, %c0_i32 : i32, i32
  }
  func.func @transform_1(%arg0: i32) -> (i32, i32) {
    %c0_i32 = arith.constant 0 : i32
    %c0_i32_0 = arith.constant 0 : i32
    %c0_i32_1 = arith.constant 0 : i32
    return %c0_i32, %c0_i32_0 : i32, i32
  }
  func.func @transform_2(%arg0: i32) -> (i32, i32) {
    %c0_i32 = arith.constant 0 : i32
    %c0_i32_0 = arith.constant 0 : i32
    %c0_i32_1 = arith.constant 0 : i32
    return %c0_i32, %c0_i32_0 : i32, i32
  }
  func.func @transform_3(%arg0: i32) -> (i32, i32) {
    %c0_i32 = arith.constant 0 : i32
    %c0_i32_0 = arith.constant 0 : i32
    %c0_i32_1 = arith.constant 0 : i32
    return %c0_i32, %c0_i32_0 : i32, i32
  }
  func.func @transform_4(%arg0: i32) -> (i32, i32) {
    %c0_i32 = arith.constant 0 : i32
    %c0_i32_0 = arith.constant 0 : i32
    %c0_i32_1 = arith.constant 0 : i32
    return %c0_i32, %c0_i32_0 : i32, i32
  }
  func.func @transform_5(%arg0: i32) -> (i32, i32) {
    %c0_i32 = arith.constant 0 : i32
    %c0_i32_0 = arith.constant 0 : i32
    %c0_i32_1 = arith.constant 0 : i32
    return %c0_i32, %c0_i32_0 : i32, i32
  }
  func.func @transform_6(%arg0: i32) -> (i32, i32) {
    %c0_i32 = arith.constant 0 : i32
    %c0_i32_0 = arith.constant 0 : i32
    %c0_i32_1 = arith.constant 0 : i32
    return %c0_i32, %c0_i32_0 : i32, i32
  }
  func.func @transform_7(%arg0: i32) -> (i32, i32) {
    %c0_i32 = arith.constant 0 : i32
    %c0_i32_0 = arith.constant 0 : i32
    %c0_i32_1 = arith.constant 0 : i32
    return %c0_i32, %c0_i32_0 : i32, i32
  }
  func.func @transform_8(%arg0: i32) -> (i32, i32) {
    %c0_i32 = arith.constant 0 : i32
    %c0_i32_0 = arith.constant 0 : i32
    %c0_i32_1 = arith.constant 0 : i32
    return %c0_i32, %c0_i32_0 : i32, i32
  }
  func.func @transform_9(%arg0: i32) -> (i32, i32) {
    %c0_i32 = arith.constant 0 : i32
    %c0_i32_0 = arith.constant 0 : i32
    %c0_i32_1 = arith.constant 0 : i32
    return %c0_i32, %c0_i32_0 : i32, i32
  }
  func.func @transform_10(%arg0: i32) -> (i32, i32) {
    %c0_i32 = arith.constant 0 : i32
    %c0_i32_0 = arith.constant 0 : i32
    %c0_i32_1 = arith.constant 0 : i32
    return %c0_i32, %c0_i32_0 : i32, i32
  }
  func.func @transform_11(%arg0: i32) -> (i32, i32) {
    %c0_i32 = arith.constant 0 : i32
    %c0_i32_0 = arith.constant 0 : i32
    return %arg0, %c0_i32 : i32, i32
  }
}

</mosaic_0001>

<bundles_post_ra>
// kernel: temporal_nn_forward.2
= control target key start
LH: loop header
LB: loop body
LE: loop exit
PB: predicated region body
PF: predicated region fallthrough
CT: control target
= control target key end

     0   :  { %v2986_v1 = vmov 0.0|0.0   ;;  %vm2987_vm0 = vmmov 0   ;;  %v2988_v2 = vmov 0.0   ;;  %vm18_vm1 = vcmask 1048064   ;;  %s3710_s1 = inlined_call_operand.vmem [shape: bf16[2,128,128], index: 1, kind: input, shape index: {}]   ;;  %s3711_s2 = inlined_call_operand.vmem [shape: f32[2,128,128], index: 2, kind: input, shape index: {}]   ;;  %s3712_s0 = inlined_call_operand.vmem [shape: f32[64,128], index: 0, kind: input, shape index: {}]   ;;  %s3713_s4 = inlined_call_operand.vmem [shape: f32[64,128], index: 4, kind: output, shape index: {}]   ;;  %s3714_s3 = inlined_call_operand.vmem [shape: f32[2,1,128], index: 3, kind: input, shape index: {}]  }
   0x1   :  { %v2938_v0 = vld [vmem:[%s3710_s1] sm:$0xff]   ;;  %2551 = vmatprep.subr.bf16.mxu1 %v2986_v1  ;;  %1999 = vmatprep.mubr.msk.f32.mxu1 %vm2987_vm0, %v2988_v2  ;;  %v2939_v3 = vld [vmem:[%s3710_s1 + $0x8] sm:$0xff]   ;;  %v2940_v4 = vld [vmem:[%s3710_s1 + $0x10] sm:$0xff]   ;;  %19 = vst.msk [vmem:[%s3713_s4] sm:$0xff] %vm18_vm1, %v2988_v2  ;;  %vm183_vm2 = vcmask 523520   ;;  %vm281_vm3 = vcmask 261120  }
   0x2   :  { %1943 = vmatprep.subr.bf16.mxu0 %v2938_v0  ;;  %v192_v5 = vld [vmem:[%s3711_s2] sm:$0xff]  ;;  %v193_v6 = vld [vmem:[%s3711_s2 + $0x8] sm:$0xff]  ;;  %v2941_v7 = vld [vmem:[%s3710_s1 + $0x18] sm:$0xff]   ;;  %20 = vst.msk [vmem:[%s3713_s4 + $0x8] sm:$0xff] %vm18_vm1, %v2988_v2 }
   0x3   :  { %1944 = vmatpush3.bf16.msra.mxu0 %v2938_v0  ;;  %v3035_v8 = vpack.c.bf16 %v193_v6, %v192_v5  ;;  %v194_v9 = vld [vmem:[%s3711_s2 + $0x10] sm:$0xff]  ;;  %v195_v10 = vld [vmem:[%s3711_s2 + $0x18] sm:$0xff]  ;;  %v196_v12 = vld [vmem:[%s3711_s2 + $0x20] sm:$0xff]  ;;  %21 = vst.msk [vmem:[%s3713_s4 + $0x10] sm:$0xff] %vm18_vm1, %v2988_v2 }
   0x4   :  { %1945 = vmatprep.subr.bf16.mxu0 %v2939_v3  ;;  %v3044_v11 = vpack.c.bf16 %v195_v10, %v194_v9  ;;  %v197_v13 = vld [vmem:[%s3711_s2 + $0x28] sm:$0xff]  ;;  %v27_v14 = vld [vmem:[%s3712_s0] sm:$0xff]  ;;  %v198_v19 = vld [vmem:[%s3711_s2 + $0x30] sm:$0xff]  ;;  %22 = vst.msk [vmem:[%s3713_s4 + $0x18] sm:$0xff] %vm18_vm1, %v2988_v2 }
   0x5   :  { %2553 = vmatpush3.bf16.msra.mxu1 %v3035_v8  ;;  %v28_v15 = vld [vmem:[%s3712_s0 + $0x8] sm:$0xff]  ;;  %v2942_v17 = vld [vmem:[%s3710_s1 + $0x20] sm:$0xff]   ;;  %v3063_v18 = vpack.c.bf16 %v197_v13, %v196_v12  ;;  %v199_v20 = vld [vmem:[%s3711_s2 + $0x38] sm:$0xff]  ;;  %23 = vst.msk [vmem:[%s3713_s4 + $0x20] sm:$0xff] %vm18_vm1, %v2988_v2 }
   0x6   :  { %2554 = vmatprep.subr.bf16.mxu1 %v2986_v1  ;;  %v35_v16 = vpack.c.bf16 %v28_v15, %v27_v14  ;;  %v2943_v21 = vld [vmem:[%s3710_s1 + $0x28] sm:$0xff]   ;;  %v200_v22 = vld [vmem:[%s3711_s2 + $0x40] sm:$0xff]  ;;  %v3082_v24 = vpack.c.bf16 %v199_v20, %v198_v19  ;;  %v2944_v25 = vld [vmem:[%s3710_s1 + $0x30] sm:$0xff]   ;;  %24 = vst.msk [vmem:[%s3713_s4 + $0x28] sm:$0xff] %vm18_vm1, %v2988_v2 }
   0x7   :  { %1946 = vmatpush3.bf16.msra.mxu0 %v2939_v3  ;;  %v201_v23 = vld [vmem:[%s3711_s2 + $0x48] sm:$0xff]  ;;  %v202_v27 = vld [vmem:[%s3711_s2 + $0x50] sm:$0xff]  ;;  %v203_v28 = vld [vmem:[%s3711_s2 + $0x58] sm:$0xff]  ;;  %25 = vst.msk [vmem:[%s3713_s4 + $0x30] sm:$0xff] %vm18_vm1, %v2988_v2 }
   0x8   :  { %1947 = vmatprep.subr.bf16.mxu0 %v2940_v4  ;;  %1959 = vmatprep.mubr.bf16.mxu0 %v35_v16  ;;  %v3089_v26 = vpack.c.bf16 %v201_v23, %v200_v22  ;;  %v2945_v29 = vld [vmem:[%s3710_s1 + $0x38] sm:$0xff]   ;;  %v3102_v30 = vpack.c.bf16 %v203_v28, %v202_v27  ;;  %v204_v31 = vld [vmem:[%s3711_s2 + $0x60] sm:$0xff]  ;;  %v205_v32 = vld [vmem:[%s3711_s2 + $0x68] sm:$0xff]  ;;  %26 = vst.msk [vmem:[%s3713_s4 + $0x38] sm:$0xff] %vm18_vm1, %v2988_v2 }
   0x9   :  { %2556 = vmatpush3.bf16.msra.mxu1 %v3044_v11  ;;  %v29_v33 = vld [vmem:[%s3712_s0 + $0x10] sm:$0xff]  ;;  %v30_v34 = vld [vmem:[%s3712_s0 + $0x18] sm:$0xff]  ;;  %v31_v35 = vld [vmem:[%s3712_s0 + $0x20] sm:$0xff]  ;;  %v3124_v37 = vpack.c.bf16 %v205_v32, %v204_v31 }
   0xa   :  { %2557 = vmatprep.subr.bf16.mxu1 %v2986_v1  ;;  %v32_v36 = vld [vmem:[%s3712_s0 + $0x28] sm:$0xff]  ;;  %v36_v38 = vpack.c.bf16 %v30_v34, %v29_v33  ;;  %v206_v39 = vld [vmem:[%s3711_s2 + $0x70] sm:$0xff]  ;;  %v207_v40 = vld [vmem:[%s3711_s2 + $0x78] sm:$0xff] }
   0xb   :  { %1948 = vmatpush3.bf16.msra.mxu0 %v2940_v4  ;;  %v37_v41 = vpack.c.bf16 %v32_v36, %v31_v35  ;;  %v3135_v42 = vpack.c.bf16 %v207_v40, %v206_v39  ;;  %v33_v43 = vld [vmem:[%s3712_s0 + $0x30] sm:$0xff]  ;;  %v34_v44 = vld [vmem:[%s3712_s0 + $0x38] sm:$0xff]  ;;  %v1596_v46 = vld [vmem:[%s3714_s3] ss:$0 sm:$0xff] }
   0xc   :  { %1949 = vmatprep.subr.bf16.mxu0 %v2941_v7  ;;  %v38_v45 = vpack.c.bf16 %v34_v44, %v33_v43  ;;  %v2947_v32 = vld [vmem:[%s3710_s1 + $0x48] sm:$0xff]   ;;  %v2949_v39 = vld [vmem:[%s3710_s1 + $0x58] sm:$0xff]   ;;  %v2950_v40 = vld [vmem:[%s3710_s1 + $0x60] sm:$0xff]  }
   0xd   :  { %2559 = vmatpush3.bf16.msra.mxu1 %v3063_v18  ;;  %v1633_v44 = vld [vmem:[%s3711_s2 + $0x90] sm:$0xff] }
   0xe   :  { %2560 = vmatprep.subr.bf16.mxu1 %v2986_v1 }
   0xf   :  { %1950 = vmatpush3.bf16.msra.mxu0 %v2941_v7 }
  0x10   :  { %1951 = vmatprep.subr.bf16.mxu0 %v2942_v17 }
  0x11   :  { %2562 = vmatpush3.bf16.msra.mxu1 %v3082_v24 }
  0x12   :  { %2563 = vmatprep.subr.bf16.mxu1 %v2986_v1 }
  0x13   :  { %1952 = vmatpush3.bf16.msra.mxu0 %v2942_v17 }
  0x14   :  { %1953 = vmatprep.subr.bf16.mxu0 %v2943_v21 }
  0x15   :  { %2565 = vmatpush3.bf16.msra.mxu1 %v3089_v26 }
  0x16   :  { %2566 = vmatprep.subr.bf16.mxu1 %v2986_v1 }
  0x17   :  { %1954 = vmatpush3.bf16.msra.mxu0 %v2943_v21 }
  0x18   :  { %1955 = vmatprep.subr.bf16.mxu0 %v2944_v25 }
  0x19   :  { %2568 = vmatpush3.bf16.msra.mxu1 %v3102_v30 }
  0x1a   :  { %2569 = vmatprep.subr.bf16.mxu1 %v2986_v1 }
  0x1b   :  { %1956 = vmatpush3.bf16.msra.mxu0 %v2944_v25 }
  0x1c   :  { %1957 = vmatprep.subr.bf16.mxu0 %v2945_v29 }
  0x1d   :  { %2571 = vmatpush3.bf16.msra.mxu1 %v3124_v37 }
  0x1e   :  { %2572 = vmatprep.subr.bf16.mxu1 %v2986_v1 }
  0x1f   :  { %1958 = vmatpush3.bf16.msra.mxu0 %v2945_v29 }
  0x20   :  { %2575 = vmatprep.subr.bf16.mxu0 %v2986_v1 }
  0x21   :  { %2574 = vmatpush3.bf16.msra.mxu1 %v3135_v42 }
  0x22   :  { %1960 = vmatmul.mubr.bf16.vlgmr.msra.gmra.mrb[0].mxu0 %v36_v38  ;;  %2599 = vmatprep.subr.bf16.mxu1 %v2986_v1  ;;  %v2948_v38 = vld [vmem:[%s3710_s1 + $0x50] sm:$0xff]  }
  0x23   :  { %1963 = vmatprep.mubr.bf16.mxu0 %v37_v41  ;;  %2577 = vmatpush3.bf16.msra.mxu0 %v3035_v8  ;;  %v1631_v41 = vld [vmem:[%s3711_s2 + $0x80] sm:$0xff] }
  0x24   :  { %2578 = vmatprep.subr.bf16.mxu0 %v2986_v1  ;;  %2000 = vmatmul.mubr.f32.vlgmr.msra.gmra.mrb[0].mxu1 %v2988_v2 }
  0x25   :  { %2601 = vmatpush3.bf16.msra.mxu1 %v3035_v8  ;;  %2069 = vmatprep.mubr.msk.f32.mxu1 %vm2987_vm0, %v2988_v2 }
  0x26   :  { %2602 = vmatprep.subr.bf16.mxu1 %v2986_v1 }
  0x27   :  { %2580 = vmatpush3.bf16.msra.mxu0 %v3044_v11 }
  0x28   :  { %2581 = vmatprep.subr.bf16.mxu0 %v2986_v1 }
  0x29   :  { %2604 = vmatpush3.bf16.msra.mxu1 %v3044_v11 }
  0x2a   :  { %1964 = vmatmul.mubr.bf16.gmra.mrb[4].mxu0 %v38_v45  ;;  %2605 = vmatprep.subr.bf16.mxu1 %v2986_v1  ;;  %v1634_v45 = vld [vmem:[%s3711_s2 + $0x98] sm:$0xff] }
  0x2b   :  { %2583 = vmatpush3.bf16.msra.mxu0 %v3063_v18  ;;  %2034 = vmatprep.mubr.msk.f32.mxu0 %vm2987_vm0, %v2988_v2 }
  0x2c   :  { %2584 = vmatprep.subr.bf16.mxu0 %v2986_v1 }
  0x2d   :  { %2607 = vmatpush3.bf16.msra.mxu1 %v3063_v18 }
  0x2e   :  { %2608 = vmatprep.subr.bf16.mxu1 %v2986_v1 }
  0x2f   :  { %2586 = vmatpush3.bf16.msra.mxu0 %v3082_v24 }
  0x30   :  { %2587 = vmatprep.subr.bf16.mxu0 %v2986_v1 }
  0x31   :  { %2610 = vmatpush3.bf16.msra.mxu1 %v3082_v24 }
  0x32   :  { %2611 = vmatprep.subr.bf16.mxu1 %v2986_v1 }
  0x33   :  { %2589 = vmatpush3.bf16.msra.mxu0 %v3089_v26 }
  0x34   :  { %2590 = vmatprep.subr.bf16.mxu0 %v2986_v1 }
  0x35   :  { %2613 = vmatpush3.bf16.msra.mxu1 %v3089_v26 }
  0x36   :  { %2614 = vmatprep.subr.bf16.mxu1 %v2986_v1 }
  0x37   :  { %2592 = vmatpush3.bf16.msra.mxu0 %v3102_v30 }
  0x38   :  { %2593 = vmatprep.subr.bf16.mxu0 %v2986_v1 }
  0x39   :  { %2616 = vmatpush3.bf16.msra.mxu1 %v3102_v30 }
  0x3a   :  { %2617 = vmatprep.subr.bf16.mxu1 %v2986_v1 }
  0x3b   :  { %2595 = vmatpush3.bf16.msra.mxu0 %v3124_v37 }
  0x3c   :  { %2596 = vmatprep.subr.bf16.mxu0 %v2986_v1 }
  0x3d   :  { %2619 = vmatpush3.bf16.msra.mxu1 %v3124_v37 }
  0x3e   :  { %2620 = vmatprep.subr.bf16.mxu1 %v2986_v1 }
  0x3f   :  { %2598 = vmatpush3.bf16.msra.mxu0 %v3135_v42 }
  0x40   :  { %2623 = vmatprep.subr.bf16.mxu0 %v2986_v1 }
  0x41   :  { %2622 = vmatpush3.bf16.msra.mxu1 %v3135_v42 }
  0x42   :  { %2647 = vmatprep.subr.bf16.mxu1 %v2986_v1 }
  0xf5   :  { %v1961_v47 = vpop.f32.mrb[0].mxu0 }
  0xf6   :  { %v153_v48 = vadd.f32 %v1961_v47, %v1596_v46  ;;  %v144_v49 = vpop.f32.mrb[1].mxu0  ;;  %v3406_v47 = vpack.c.bf16 %v1634_v45, %v1633_v44 }
  0xf7   :  { %v145_v50 = vadd.f32 %v1596_v46, %v144_v49  ;;  %v1962_v51 = vpop.f32.mrb[2].mxu0  ;;  %v275_v55 = vpop.f32.mrb[0].mxu1  ;;  %v1636_v49 = vld [vmem:[%s3711_s2 + $0xa8] sm:$0xff] }
  0xf8   :  { %177 = vst [vmem:[#allocation2 + $0x10] sm:$0xff] %v153_v48  ;;  %v156_v52 = vadd.f32 %v1962_v51, %v1596_v46  ;;  %v147_v53 = vpop.f32.mrb[3].mxu0  ;;  %v2001_v56 = vpop.f32.mrb[1].mxu1 }
  0xf9   :  { %175 = vst [vmem:[#allocation2] sm:$0xff] %v145_v50  ;;  %v148_v54 = vadd.f32 %v1596_v46, %v147_v53  ;;  %v1637_v53 = vld [vmem:[%s3711_s2 + $0xb0] sm:$0xff]  ;;  %v1639_v56 = vld [vmem:[%s3711_s2 + $0xc0] sm:$0xff] }
  0xfa   :  { %178 = vst [vmem:[#allocation2 + $0x18] sm:$0xff] %v156_v52 }
  0xfb   :  { %176 = vst [vmem:[#allocation2 + $0x8] sm:$0xff] %v148_v54 }
  0xfd   :  { %v1965_v57 = vpop.f32.mrb[4].mxu0 }
  0xfe   :  { %v169_v58 = vadd.f32 %v1965_v57, %v1596_v46  ;;  %v160_v59 = vpop.f32.mrb[5].mxu0  ;;  %v1640_v57 = vld [vmem:[%s3711_s2 + $0xc8] sm:$0xff] }
  0xff   :  { %v161_v60 = vadd.f32 %v1596_v46, %v160_v59  ;;  %v1966_v61 = vpop.f32.mrb[6].mxu0  ;;  %v1641_v59 = vld [vmem:[%s3711_s2 + $0xd0] sm:$0xff] }
 0x100   :  { %181 = vst [vmem:[#allocation2 + $0x30] sm:$0xff] %v169_v58  ;;  %185 = vst.msk [vmem:[#allocation2 + $0x8] sm:$0xff] %vm183_vm2, %v169_v58  ;;  %v172_v62 = vadd.f32 %v1966_v61, %v1596_v46  ;;  %v163_v63 = vpop.f32.mrb[7].mxu0  ;;  %v3444_v58 = vpack.c.bf16 %v1640_v57, %v1639_v56 }
 0x101   :  { %190 = vst.msk [vmem:[#allocation2 + $0x30] sm:$0xff] %vm183_vm2, %v148_v54  ;;  %179 = vst [vmem:[#allocation2 + $0x20] sm:$0xff] %v161_v60  ;;  %v164_v0 = vadd.f32 %v1596_v46, %v163_v63  ;;  %v2951_v46 = vld [vmem:[%s3710_s1 + $0x68] sm:$0xff]   ;;  %v1638_v54 = vld [vmem:[%s3711_s2 + $0xb8] sm:$0xff] }
 0x102   :  { %187 = vst.msk [vmem:[#allocation2 + $0x18] sm:$0xff] %vm183_vm2, %v161_v60  ;;  %188 = vst.msk [vmem:[#allocation2 + $0x20] sm:$0xff] %vm183_vm2, %v156_v52  ;;  %v2953_v52 = vld [vmem:[%s3710_s1 + $0x78] sm:$0xff]   ;;  %v1644_v63 = vld [vmem:[%s3711_s2 + $0xe8] sm:$0xff] }
 0x103   :  { %182 = vst [vmem:[#allocation2 + $0x38] sm:$0xff] %v172_v62  ;;  %184 = vst.msk [vmem:[#allocation2] sm:$0xff] %vm183_vm2, %v172_v62  ;;  %v1642_v60 = vld [vmem:[%s3711_s2 + $0xd8] sm:$0xff]  ;;  %v1643_v62 = vld [vmem:[%s3711_s2 + $0xe0] sm:$0xff] }
 0x104   :  { %191 = vst.msk [vmem:[#allocation2 + $0x38] sm:$0xff] %vm183_vm2, %v145_v50  ;;  %180 = vst [vmem:[#allocation2 + $0x28] sm:$0xff] %v164_v0  ;;  %v2952_v50 = vld [vmem:[%s3710_s1 + $0x70] sm:$0xff]   ;;  %v3454_v61 = vpack.c.bf16 %v1642_v60, %v1641_v59 }
 0x105   :  { %186 = vst.msk [vmem:[#allocation2 + $0x10] sm:$0xff] %vm183_vm2, %v164_v0  ;;  %189 = vst.msk [vmem:[#allocation2 + $0x28] sm:$0xff] %vm183_vm2, %v153_v48  ;;  %v1635_v48 = vld [vmem:[%s3711_s2 + $0xa0] sm:$0xff]  ;;  %v3464_v0 = vpack.c.bf16 %v1644_v63, %v1643_v62 }
 0x106   :  { %v3419_v51 = vpack.c.bf16 %v1636_v49, %v1635_v48 }
 0x107   :  { %v284_v6 = vld [vmem:[#allocation2 + $0x8] sm:$0xff] }
 0x108   :  { %v659_v33 = vld [vmem:[#allocation2 + $0x30] sm:$0xff] }
 0x109   :  { %v434_v19 = vld [vmem:[#allocation2 + $0x18] sm:$0xff]  ;;  %v509_v25 = vld [vmem:[#allocation2 + $0x20] sm:$0xff] }
 0x10a   :  { %v208_v3 = vld [vmem:[#allocation2] sm:$0xff] }
 0x10b   :  { %v279_v4 = vadd.f32 %v275_v55, %v208_v3  ;;  %v3433_v55 = vpack.c.bf16 %v1638_v54, %v1637_v53  ;;  %v1645_v3 = vld [vmem:[%s3711_s2 + $0xf0] sm:$0xff] }
 0x10c   :  { %v359_v13 = vld [vmem:[#allocation2 + $0x10] sm:$0xff] }
 0x10d   :  { %2954 = vtanh.f32 %v279_v4  ;;  %v1646_v4 = vld [vmem:[%s3711_s2 + $0xf8] sm:$0xff] }
 0x117   :  { %v2955_v5 = vpop.eup %2954 }
 0x118   :  { %2035 = vmatmul.mubr.f32.vlgmr.msra.gmra.mrb[8].mxu0 %v2955_v5  ;;  %282 = vst.msk [vmem:[%s3713_s4] sm:$0xff] %vm281_vm3, %v2955_v5 }
 0x119   :  { %283 = vst.msk [vmem:[%s3713_s4 + $0x38] sm:$0xff] %vm183_vm2, %v2955_v5  ;;  %2625 = vmatpush3.bf16.msra.mxu0 %v3035_v8  ;;  %2104 = vmatprep.mubr.msk.f32.mxu0 %vm2987_vm0, %v2988_v2  ;;  %v3473_v5 = vpack.c.bf16 %v1646_v4, %v1645_v3 }
 0x11a   :  { %2626 = vmatprep.subr.bf16.mxu0 %v2986_v1 }
 0x11d   :  { %2628 = vmatpush3.bf16.msra.mxu0 %v3044_v11 }
 0x11e   :  { %2629 = vmatprep.subr.bf16.mxu0 %v2986_v1 }
 0x121   :  { %2631 = vmatpush3.bf16.msra.mxu0 %v3063_v18 }
 0x122   :  { %2632 = vmatprep.subr.bf16.mxu0 %v2986_v1 }
 0x125   :  { %2634 = vmatpush3.bf16.msra.mxu0 %v3082_v24 }
 0x126   :  { %2635 = vmatprep.subr.bf16.mxu0 %v2986_v1 }
 0x129   :  { %2637 = vmatpush3.bf16.msra.mxu0 %v3089_v26 }
 0x12a   :  { %2638 = vmatprep.subr.bf16.mxu0 %v2986_v1 }
 0x12d   :  { %2640 = vmatpush3.bf16.msra.mxu0 %v3102_v30 }
 0x12e   :  { %2641 = vmatprep.subr.bf16.mxu0 %v2986_v1 }
 0x131   :  { %2643 = vmatpush3.bf16.msra.mxu0 %v3124_v37 }
 0x132   :  { %2644 = vmatprep.subr.bf16.mxu0 %v2986_v1 }
 0x135   :  { %2646 = vmatpush3.bf16.msra.mxu0 %v3135_v42 }
 0x136   :  { %2671 = vmatprep.subr.bf16.mxu0 %v2986_v1 }
 0x1eb   :  { %v351_v7 = vpop.f32.mrb[8].mxu0 }
 0x1ec   :  { %v355_v9 = vadd.f32 %v351_v7, %v284_v6  ;;  %v2036_v10 = vpop.f32.mrb[9].mxu0  ;;  %v734_v6 = vld [vmem:[#allocation2 + $0x38] sm:$0xff] }
 0x1ee   :  { %2956 = vtanh.f32 %v355_v9 }
 0x1f8   :  { %v2957_v12 = vpop.eup %2956 }
 0x1f9   :  { %2070 = vmatmul.mubr.f32.vlgmr.msra.gmra.mrb[2].mxu1 %v2957_v12  ;;  %357 = vst.msk [vmem:[%s3713_s4 + $0x8] sm:$0xff] %vm281_vm3, %v2957_v12 }
 0x1fa   :  { %358 = vst.msk [vmem:[%s3713_s4 + $0x30] sm:$0xff] %vm183_vm2, %v2957_v12  ;;  %2649 = vmatpush3.bf16.msra.mxu1 %v3035_v8  ;;  %2139 = vmatprep.mubr.msk.f32.mxu1 %vm2987_vm0, %v2988_v2 }
 0x1fb   :  { %2650 = vmatprep.subr.bf16.mxu1 %v2986_v1 }
 0x1fe   :  { %2652 = vmatpush3.bf16.msra.mxu1 %v3044_v11 }
 0x1ff   :  { %2653 = vmatprep.subr.bf16.mxu1 %v2986_v1 }
 0x202   :  { %2655 = vmatpush3.bf16.msra.mxu1 %v3063_v18 }
 0x203   :  { %2656 = vmatprep.subr.bf16.mxu1 %v2986_v1 }
 0x206   :  { %2658 = vmatpush3.bf16.msra.mxu1 %v3082_v24 }
 0x207   :  { %2659 = vmatprep.subr.bf16.mxu1 %v2986_v1 }
 0x20a   :  { %2661 = vmatpush3.bf16.msra.mxu1 %v3089_v26 }
 0x20b   :  { %2662 = vmatprep.subr.bf16.mxu1 %v2986_v1 }
 0x20e   :  { %2664 = vmatpush3.bf16.msra.mxu1 %v3102_v30 }
 0x20f   :  { %2665 = vmatprep.subr.bf16.mxu1 %v2986_v1 }
 0x212   :  { %2667 = vmatpush3.bf16.msra.mxu1 %v3124_v37 }
 0x213   :  { %2668 = vmatprep.subr.bf16.mxu1 %v2986_v1 }
 0x216   :  { %2670 = vmatpush3.bf16.msra.mxu1 %v3135_v42 }
 0x217   :  { %2695 = vmatprep.subr.bf16.mxu1 %v2986_v1 }
 0x2cc   :  { %v426_v14 = vpop.f32.mrb[2].mxu1 }
 0x2cd   :  { %v430_v15 = vadd.f32 %v426_v14, %v359_v13  ;;  %v2071_v16 = vpop.f32.mrb[3].mxu1 }
 0x2cf   :  { %2958 = vtanh.f32 %v430_v15 }
 0x2d9   :  { %v2959_v17 = vpop.eup %2958 }
 0x2da   :  { %2105 = vmatmul.mubr.f32.vlgmr.msra.gmra.mrb[10].mxu0 %v2959_v17  ;;  %432 = vst.msk [vmem:[%s3713_s4 + $0x10] sm:$0xff] %vm281_vm3, %v2959_v17 }
 0x2db   :  { %433 = vst.msk [vmem:[%s3713_s4 + $0x28] sm:$0xff] %vm183_vm2, %v2959_v17  ;;  %2673 = vmatpush3.bf16.msra.mxu0 %v3035_v8  ;;  %2174 = vmatprep.mubr.msk.f32.mxu0 %vm2987_vm0, %v2988_v2 }
 0x2dc   :  { %2674 = vmatprep.subr.bf16.mxu0 %v2986_v1 }
 0x2df   :  { %2676 = vmatpush3.bf16.msra.mxu0 %v3044_v11 }
 0x2e0   :  { %2677 = vmatprep.subr.bf16.mxu0 %v2986_v1 }
 0x2e3   :  { %2679 = vmatpush3.bf16.msra.mxu0 %v3063_v18 }
 0x2e4   :  { %2680 = vmatprep.subr.bf16.mxu0 %v2986_v1 }
 0x2e7   :  { %2682 = vmatpush3.bf16.msra.mxu0 %v3082_v24 }
 0x2e8   :  { %2683 = vmatprep.subr.bf16.mxu0 %v2986_v1 }
 0x2eb   :  { %2685 = vmatpush3.bf16.msra.mxu0 %v3089_v26 }
 0x2ec   :  { %2686 = vmatprep.subr.bf16.mxu0 %v2986_v1 }
 0x2ef   :  { %2688 = vmatpush3.bf16.msra.mxu0 %v3102_v30 }
 0x2f0   :  { %2689 = vmatprep.subr.bf16.mxu0 %v2986_v1 }
 0x2f3   :  { %2691 = vmatpush3.bf16.msra.mxu0 %v3124_v37 }
 0x2f4   :  { %2692 = vmatprep.subr.bf16.mxu0 %v2986_v1 }
 0x2f7   :  { %2694 = vmatpush3.bf16.msra.mxu0 %v3135_v42 }
 0x2f8   :  { %2719 = vmatprep.subr.bf16.mxu0 %v2986_v1 }
 0x3ad   :  { %v501_v20 = vpop.f32.mrb[10].mxu0 }
 0x3ae   :  { %v505_v21 = vadd.f32 %v501_v20, %v434_v19  ;;  %v2106_v22 = vpop.f32.mrb[11].mxu0 }
 0x3b0   :  { %2960 = vtanh.f32 %v505_v21 }
 0x3ba   :  { %v2961_v23 = vpop.eup %2960 }
 0x3bb   :  { %2140 = vmatmul.mubr.f32.vlgmr.msra.gmra.mrb[4].mxu1 %v2961_v23  ;;  %507 = vst.msk [vmem:[%s3713_s4 + $0x18] sm:$0xff] %vm281_vm3, %v2961_v23 }
 0x3bc   :  { %508 = vst.msk [vmem:[%s3713_s4 + $0x20] sm:$0xff] %vm183_vm2, %v2961_v23  ;;  %2697 = vmatpush3.bf16.msra.mxu1 %v3035_v8  ;;  %2209 = vmatprep.mubr.msk.f32.mxu1 %vm2987_vm0, %v2988_v2 }
 0x3bd   :  { %2698 = vmatprep.subr.bf16.mxu1 %v2986_v1 }
 0x3c0   :  { %2700 = vmatpush3.bf16.msra.mxu1 %v3044_v11 }
 0x3c1   :  { %2701 = vmatprep.subr.bf16.mxu1 %v2986_v1 }
 0x3c4   :  { %2703 = vmatpush3.bf16.msra.mxu1 %v3063_v18 }
 0x3c5   :  { %2704 = vmatprep.subr.bf16.mxu1 %v2986_v1 }
 0x3c8   :  { %2706 = vmatpush3.bf16.msra.mxu1 %v3082_v24 }
 0x3c9   :  { %2707 = vmatprep.subr.bf16.mxu1 %v2986_v1 }
 0x3cc   :  { %2709 = vmatpush3.bf16.msra.mxu1 %v3089_v26 }
 0x3cd   :  { %2710 = vmatprep.subr.bf16.mxu1 %v2986_v1 }
 0x3d0   :  { %2712 = vmatpush3.bf16.msra.mxu1 %v3102_v30 }
 0x3d1   :  { %2713 = vmatprep.subr.bf16.mxu1 %v2986_v1 }
 0x3d4   :  { %2715 = vmatpush3.bf16.msra.mxu1 %v3124_v37 }
 0x3d5   :  { %2716 = vmatprep.subr.bf16.mxu1 %v2986_v1 }
 0x3d8   :  { %2718 = vmatpush3.bf16.msra.mxu1 %v3135_v42 }
 0x48e   :  { %v576_v27 = vpop.f32.mrb[4].mxu1 }
 0x48f   :  { %v580_v28 = vadd.f32 %v576_v27, %v509_v25  ;;  %v2141_v29 = vpop.f32.mrb[5].mxu1 }
 0x491   :  { %2962 = vtanh.f32 %v580_v28 }
 0x49b   :  { %v2963_v31 = vpop.eup %2962 }
 0x49c   :  { %2175 = vmatmul.mubr.f32.vlgmr.msra.gmra.mrb[12].mxu0 %v2963_v31  ;;  %583 = vst.msk [vmem:[%s3713_s4 + $0x18] sm:$0xff] %vm183_vm2, %v2963_v31 }
 0x49d   :  { %582 = vst.msk [vmem:[%s3713_s4 + $0x20] sm:$0xff] %vm281_vm3, %v2963_v31  ;;  %2721 = vmatpush3.bf16.msra.mxu0 %v3035_v8  ;;  %2244 = vmatprep.mubr.msk.f32.mxu0 %vm2987_vm0, %v2988_v2  ;;  %v584_v8 = vld [vmem:[#allocation2 + $0x28] sm:$0xff]  ;;  %v1622_v31 = vld [vmem:[%s3714_s3 + $0x1] ss:$0 sm:$0xff] }
 0x49e   :  { %2722 = vmatprep.subr.bf16.mxu0 %v2986_v1 }
 0x4a1   :  { %2724 = vmatpush3.bf16.msra.mxu0 %v3044_v11 }
 0x4a2   :  { %2725 = vmatprep.subr.bf16.mxu0 %v2986_v1 }
 0x4a3   :  { %v812_v19 = vld [vmem:[%s3713_s4 + $0x18] sm:$0xff] }
 0x4a4   :  { %v813_v21 = vld [vmem:[%s3713_s4 + $0x20] sm:$0xff] }
 0x4a5   :  { %2727 = vmatpush3.bf16.msra.mxu0 %v3063_v18 }
 0x4a6   :  { %2728 = vmatprep.subr.bf16.mxu0 %v2986_v1 }
 0x4a9   :  { %2730 = vmatpush3.bf16.msra.mxu0 %v3082_v24 }
 0x4aa   :  { %2731 = vmatprep.subr.bf16.mxu0 %v2986_v1 }
 0x4ad   :  { %2733 = vmatpush3.bf16.msra.mxu0 %v3089_v26 }
 0x4ae   :  { %2734 = vmatprep.subr.bf16.mxu0 %v2986_v1 }
 0x4b1   :  { %2736 = vmatpush3.bf16.msra.mxu0 %v3102_v30  ;;  %v2946_v30 = vld [vmem:[%s3710_s1 + $0x40] sm:$0xff]  }
 0x4b2   :  { %2737 = vmatprep.subr.bf16.mxu0 %v2986_v1  ;;  %2247 = vmatprep.subr.bf16.mxu1 %v2946_v30 }
 0x4b5   :  { %2739 = vmatpush3.bf16.msra.mxu0 %v3124_v37 }
 0x4b6   :  { %2740 = vmatprep.subr.bf16.mxu0 %v2986_v1 }
 0x4b9   :  { %2742 = vmatpush3.bf16.msra.mxu0 %v3135_v42  ;;  %v1632_v42 = vld [vmem:[%s3711_s2 + $0x88] sm:$0xff] }
 0x4ba   :  { %2743 = vmatprep.subr.bf16.mxu0 %v2986_v1  ;;  %v3394_v43 = vpack.c.bf16 %v1632_v42, %v1631_v41 }
 0x56f   :  { %v651_v11 = vpop.f32.mrb[12].mxu0 }
 0x570   :  { %v655_v18 = vadd.f32 %v651_v11, %v584_v8  ;;  %v2176_v24 = vpop.f32.mrb[13].mxu0 }
 0x572   :  { %2964 = vtanh.f32 %v655_v18 }
 0x57c   :  { %v2965_v26 = vpop.eup %2964 }
 0x57d   :  { %2210 = vmatmul.mubr.f32.vlgmr.msra.gmra.mrb[6].mxu1 %v2965_v26  ;;  %658 = vst.msk [vmem:[%s3713_s4 + $0x10] sm:$0xff] %vm183_vm2, %v2965_v26 }
 0x57e   :  { %657 = vst.msk [vmem:[%s3713_s4 + $0x28] sm:$0xff] %vm281_vm3, %v2965_v26  ;;  %2248 = vmatpush3.bf16.msra.mxu1 %v2946_v30 }
 0x57f   :  { %2249 = vmatprep.subr.bf16.mxu1 %v2947_v32 }
 0x582   :  { %2250 = vmatpush3.bf16.msra.mxu1 %v2947_v32 }
 0x583   :  { %2251 = vmatprep.subr.bf16.mxu1 %v2948_v38 }
 0x584   :  { %v811_v13 = vld [vmem:[%s3713_s4 + $0x10] sm:$0xff] }
 0x585   :  { %v814_v16 = vld [vmem:[%s3713_s4 + $0x28] sm:$0xff]  ;;  %v818_v20 = vpack.c.bf16 %v812_v19, %v811_v13 }
 0x586   :  { %2252 = vmatpush3.bf16.msra.mxu1 %v2948_v38  ;;  %v819_v22 = vpack.c.bf16 %v814_v16, %v813_v21 }
 0x587   :  { %2253 = vmatprep.subr.bf16.mxu1 %v2949_v39 }
 0x58a   :  { %2254 = vmatpush3.bf16.msra.mxu1 %v2949_v39 }
 0x58b   :  { %2255 = vmatprep.subr.bf16.mxu1 %v2950_v40 }
 0x58e   :  { %2256 = vmatpush3.bf16.msra.mxu1 %v2950_v40 }
 0x58f   :  { %2257 = vmatprep.subr.bf16.mxu1 %v2951_v46 }
 0x592   :  { %2258 = vmatpush3.bf16.msra.mxu1 %v2951_v46 }
 0x593   :  { %2259 = vmatprep.subr.bf16.mxu1 %v2952_v50 }
 0x596   :  { %2260 = vmatpush3.bf16.msra.mxu1 %v2952_v50 }
 0x597   :  { %2261 = vmatprep.subr.bf16.mxu1 %v2953_v52 }
 0x59a   :  { %2262 = vmatpush3.bf16.msra.mxu1 %v2953_v52 }
 0x59b   :  { %2767 = vmatprep.subr.bf16.mxu1 %v2986_v1 }
 0x650   :  { %v726_v34 = vpop.f32.mrb[6].mxu1 }
 0x651   :  { %v730_v35 = vadd.f32 %v726_v34, %v659_v33  ;;  %v2211_v36 = vpop.f32.mrb[7].mxu1 }
 0x653   :  { %2966 = vtanh.f32 %v730_v35 }
 0x65d   :  { %v2967_v37 = vpop.eup %2966 }
 0x65e   :  { %2245 = vmatmul.mubr.f32.vlgmr.msra.gmra.mrb[14].mxu0 %v2967_v37  ;;  %733 = vst.msk [vmem:[%s3713_s4 + $0x8] sm:$0xff] %vm183_vm2, %v2967_v37 }
 0x65f   :  { %732 = vst.msk [vmem:[%s3713_s4 + $0x30] sm:$0xff] %vm281_vm3, %v2967_v37  ;;  %2303 = vmatprep.mubr.msk.f32.mxu0 %vm2987_vm0, %v2988_v2  ;;  %2745 = vmatpush3.bf16.msra.mxu0 %v3394_v43 }
 0x660   :  { %2746 = vmatprep.subr.bf16.mxu0 %v2986_v1 }
 0x663   :  { %2748 = vmatpush3.bf16.msra.mxu0 %v3406_v47 }
 0x664   :  { %2749 = vmatprep.subr.bf16.mxu0 %v2986_v1 }
 0x665   :  { %v810_v15 = vld [vmem:[%s3713_s4 + $0x8] sm:$0xff] }
 0x666   :  { %v815_v25 = vld [vmem:[%s3713_s4 + $0x30] sm:$0xff] }
 0x667   :  { %2751 = vmatpush3.bf16.msra.mxu0 %v3419_v51 }
 0x668   :  { %2752 = vmatprep.subr.bf16.mxu0 %v2986_v1 }
 0x66b   :  { %2754 = vmatpush3.bf16.msra.mxu0 %v3433_v55 }
 0x66c   :  { %2755 = vmatprep.subr.bf16.mxu0 %v2986_v1 }
 0x66f   :  { %2757 = vmatpush3.bf16.msra.mxu0 %v3444_v58 }
 0x670   :  { %2758 = vmatprep.subr.bf16.mxu0 %v2986_v1 }
 0x673   :  { %2760 = vmatpush3.bf16.msra.mxu0 %v3454_v61 }
 0x674   :  { %2761 = vmatprep.subr.bf16.mxu0 %v2986_v1 }
 0x677   :  { %2763 = vmatpush3.bf16.msra.mxu0 %v3464_v0 }
 0x678   :  { %2764 = vmatprep.subr.bf16.mxu0 %v2986_v1 }
 0x67b   :  { %2766 = vmatpush3.bf16.msra.mxu0 %v3473_v5 }
 0x67c   :  { %2791 = vmatprep.subr.bf16.mxu0 %v2986_v1 }
 0x67e   :  { %2304 = vmatmul.mubr.f32.vlgmr.msra.gmra.mrb[16].mxu0 %v2988_v2 }
 0x67f   :  { %2793 = vmatpush3.bf16.msra.mxu0 %v3394_v43  ;;  %2373 = vmatprep.mubr.msk.f32.mxu0 %vm2987_vm0, %v2988_v2 }
 0x680   :  { %2794 = vmatprep.subr.bf16.mxu0 %v2986_v1 }
 0x683   :  { %2796 = vmatpush3.bf16.msra.mxu0 %v3406_v47 }
 0x684   :  { %2797 = vmatprep.subr.bf16.mxu0 %v2986_v1 }
 0x687   :  { %2799 = vmatpush3.bf16.msra.mxu0 %v3419_v51 }
 0x688   :  { %2800 = vmatprep.subr.bf16.mxu0 %v2986_v1 }
 0x68b   :  { %2802 = vmatpush3.bf16.msra.mxu0 %v3433_v55 }
 0x68c   :  { %2803 = vmatprep.subr.bf16.mxu0 %v2986_v1 }
 0x68f   :  { %2805 = vmatpush3.bf16.msra.mxu0 %v3444_v58 }
 0x690   :  { %2806 = vmatprep.subr.bf16.mxu0 %v2986_v1 }
 0x693   :  { %2808 = vmatpush3.bf16.msra.mxu0 %v3454_v61 }
 0x694   :  { %2809 = vmatprep.subr.bf16.mxu0 %v2986_v1 }
 0x697   :  { %2811 = vmatpush3.bf16.msra.mxu0 %v3464_v0 }
 0x698   :  { %2812 = vmatprep.subr.bf16.mxu0 %v2986_v1 }
 0x69b   :  { %2814 = vmatpush3.bf16.msra.mxu0 %v3473_v5 }
 0x69c   :  { %2839 = vmatprep.subr.bf16.mxu0 %v2986_v1 }
 0x731   :  { %v801_v7 = vpop.f32.mrb[14].mxu0 }
 0x732   :  { %v805_v9 = vadd.f32 %v801_v7, %v734_v6  ;;  %v2246_v10 = vpop.f32.mrb[15].mxu0 }
 0x734   :  { %2968 = vtanh.f32 %v805_v9 }
 0x73e   :  { %v2969_v12 = vpop.eup %2968 }
 0x73f   :  { %808 = vst.msk [vmem:[%s3713_s4] sm:$0xff] %vm183_vm2, %v2969_v12 }
 0x740   :  { %807 = vst.msk [vmem:[%s3713_s4 + $0x38] sm:$0xff] %vm281_vm3, %v2969_v12 }
 0x746   :  { %v809_v14 = vld [vmem:[%s3713_s4] sm:$0xff] }
 0x747   :  { %v817_v17 = vpack.c.bf16 %v810_v15, %v809_v14  ;;  %v816_v23 = vld [vmem:[%s3713_s4 + $0x38] sm:$0xff] }
 0x748   :  { %v820_v27 = vpack.c.bf16 %v816_v23, %v815_v25 }
 0x749   :  { %2263 = vmatprep.mubr.bf16.mxu1 %v817_v17 }
 0x74a   :  { %2264 = vmatmul.mubr.bf16.vlgmr.msra.gmra.mrb[8].mxu1 %v818_v20 }
 0x74b   :  { %2267 = vmatprep.mubr.bf16.mxu1 %v819_v22  ;;  %2769 = vmatpush3.bf16.msra.mxu1 %v3394_v43 }
 0x74c   :  { %2770 = vmatprep.subr.bf16.mxu1 %v2986_v1 }
 0x74f   :  { %2772 = vmatpush3.bf16.msra.mxu1 %v3406_v47 }
 0x750   :  { %2773 = vmatprep.subr.bf16.mxu1 %v2986_v1 }
 0x751   :  { %v1059_v28 = vpop.f32.mrb[16].mxu0 }
 0x752   :  { %2268 = vmatmul.mubr.bf16.gmra.mrb[12].mxu1 %v820_v27  ;;  %v2305_v29 = vpop.f32.mrb[17].mxu0 }
 0x753   :  { %2775 = vmatpush3.bf16.msra.mxu1 %v3419_v51  ;;  %2338 = vmatprep.mubr.msk.f32.mxu1 %vm2987_vm0, %v2988_v2 }
 0x754   :  { %2776 = vmatprep.subr.bf16.mxu1 %v2986_v1 }
 0x757   :  { %2778 = vmatpush3.bf16.msra.mxu1 %v3433_v55 }
 0x758   :  { %2779 = vmatprep.subr.bf16.mxu1 %v2986_v1 }
 0x75b   :  { %2781 = vmatpush3.bf16.msra.mxu1 %v3444_v58 }
 0x75c   :  { %2782 = vmatprep.subr.bf16.mxu1 %v2986_v1 }
 0x75f   :  { %2784 = vmatpush3.bf16.msra.mxu1 %v3454_v61 }
 0x760   :  { %2785 = vmatprep.subr.bf16.mxu1 %v2986_v1 }
 0x763   :  { %2787 = vmatpush3.bf16.msra.mxu1 %v3464_v0 }
 0x764   :  { %2788 = vmatprep.subr.bf16.mxu1 %v2986_v1 }
 0x767   :  { %2790 = vmatpush3.bf16.msra.mxu1 %v3473_v5 }
 0x768   :  { %2815 = vmatprep.subr.bf16.mxu1 %v2986_v1 }
 0x81d   :  { %v2265_v8 = vpop.f32.mrb[8].mxu1 }
 0x81e   :  { %v937_v11 = vadd.f32 %v2265_v8, %v1622_v31  ;;  %v928_v18 = vpop.f32.mrb[9].mxu1 }
 0x81f   :  { %v929_v24 = vadd.f32 %v1622_v31, %v928_v18  ;;  %v2266_v26 = vpop.f32.mrb[10].mxu1 }
 0x820   :  { %961 = vst [vmem:[#allocation2 + $0x10] sm:$0xff] %v937_v11  ;;  %v940_v30 = vadd.f32 %v2266_v26, %v1622_v31  ;;  %v931_v32 = vpop.f32.mrb[11].mxu1 }
 0x821   :  { %959 = vst [vmem:[#allocation2] sm:$0xff] %v929_v24  ;;  %v932_v33 = vadd.f32 %v1622_v31, %v931_v32 }
 0x822   :  { %962 = vst [vmem:[#allocation2 + $0x18] sm:$0xff] %v940_v30 }
 0x823   :  { %960 = vst [vmem:[#allocation2 + $0x8] sm:$0xff] %v932_v33 }
 0x825   :  { %v2269_v34 = vpop.f32.mrb[12].mxu1 }
 0x826   :  { %v953_v35 = vadd.f32 %v2269_v34, %v1622_v31  ;;  %v944_v36 = vpop.f32.mrb[13].mxu1 }
 0x827   :  { %v945_v37 = vadd.f32 %v1622_v31, %v944_v36  ;;  %v2270_v38 = vpop.f32.mrb[14].mxu1 }
 0x828   :  { %965 = vst [vmem:[#allocation2 + $0x30] sm:$0xff] %v953_v35  ;;  %968 = vst.msk [vmem:[#allocation2 + $0x8] sm:$0xff] %vm183_vm2, %v953_v35  ;;  %v956_v39 = vadd.f32 %v2270_v38, %v1622_v31  ;;  %v947_v40 = vpop.f32.mrb[15].mxu1 }
 0x829   :  { %973 = vst.msk [vmem:[#allocation2 + $0x30] sm:$0xff] %vm183_vm2, %v932_v33  ;;  %963 = vst [vmem:[#allocation2 + $0x20] sm:$0xff] %v945_v37  ;;  %v948_v41 = vadd.f32 %v1622_v31, %v947_v40 }
 0x82a   :  { %970 = vst.msk [vmem:[#allocation2 + $0x18] sm:$0xff] %vm183_vm2, %v945_v37  ;;  %971 = vst.msk [vmem:[#allocation2 + $0x20] sm:$0xff] %vm183_vm2, %v940_v30 }
 0x82b   :  { %966 = vst [vmem:[#allocation2 + $0x38] sm:$0xff] %v956_v39  ;;  %967 = vst.msk [vmem:[#allocation2] sm:$0xff] %vm183_vm2, %v956_v39 }
 0x82c   :  { %974 = vst.msk [vmem:[#allocation2 + $0x38] sm:$0xff] %vm183_vm2, %v929_v24  ;;  %964 = vst [vmem:[#allocation2 + $0x28] sm:$0xff] %v948_v41 }
 0x82d   :  { %969 = vst.msk [vmem:[#allocation2 + $0x10] sm:$0xff] %vm183_vm2, %v948_v41  ;;  %972 = vst.msk [vmem:[#allocation2 + $0x28] sm:$0xff] %vm183_vm2, %v937_v11 }
 0x82f   :  { %v1067_v46 = vld [vmem:[#allocation2 + $0x8] sm:$0xff] }
 0x831   :  { %v1217_v60 = vld [vmem:[#allocation2 + $0x18] sm:$0xff]  ;;  %v1292_v6 = vld [vmem:[#allocation2 + $0x20] sm:$0xff] }
 0x832   :  { %v992_v42 = vld [vmem:[#allocation2] sm:$0xff] }
 0x833   :  { %v1063_v44 = vadd.f32 %v1059_v28, %v992_v42  ;;  %v1517_v13 = vld [vmem:[#allocation2 + $0x38] sm:$0xff] }
 0x834   :  { %v1142_v53 = vld [vmem:[#allocation2 + $0x10] sm:$0xff] }
 0x835   :  { %2970 = vtanh.f32 %v1063_v44 }
 0x83f   :  { %v2971_v45 = vpop.eup %2970 }
 0x840   :  { %1065 = vst.msk [vmem:[%s3713_s4] sm:$0xff] %vm281_vm3, %v2971_v45  ;;  %2339 = vmatmul.mubr.f32.vlgmr.msra.gmra.mrb[16].mxu1 %v2971_v45 }
 0x841   :  { %1066 = vst.msk [vmem:[%s3713_s4 + $0x38] sm:$0xff] %vm183_vm2, %v2971_v45  ;;  %2817 = vmatpush3.bf16.msra.mxu1 %v3394_v43  ;;  %2408 = vmatprep.mubr.msk.f32.mxu1 %vm2987_vm0, %v2988_v2 }
 0x842   :  { %2818 = vmatprep.subr.bf16.mxu1 %v2986_v1 }
 0x845   :  { %2820 = vmatpush3.bf16.msra.mxu1 %v3406_v47 }
 0x846   :  { %2821 = vmatprep.subr.bf16.mxu1 %v2986_v1 }
 0x849   :  { %2823 = vmatpush3.bf16.msra.mxu1 %v3419_v51 }
 0x84a   :  { %2824 = vmatprep.subr.bf16.mxu1 %v2986_v1 }
 0x84d   :  { %2826 = vmatpush3.bf16.msra.mxu1 %v3433_v55 }
 0x84e   :  { %2827 = vmatprep.subr.bf16.mxu1 %v2986_v1 }
 0x851   :  { %2829 = vmatpush3.bf16.msra.mxu1 %v3444_v58 }
 0x852   :  { %2830 = vmatprep.subr.bf16.mxu1 %v2986_v1 }
 0x855   :  { %2832 = vmatpush3.bf16.msra.mxu1 %v3454_v61 }
 0x856   :  { %2833 = vmatprep.subr.bf16.mxu1 %v2986_v1 }
 0x859   :  { %2835 = vmatpush3.bf16.msra.mxu1 %v3464_v0 }
 0x85a   :  { %2836 = vmatprep.subr.bf16.mxu1 %v2986_v1 }
 0x85d   :  { %2838 = vmatpush3.bf16.msra.mxu1 %v3473_v5 }
 0x85e   :  { %2863 = vmatprep.subr.bf16.mxu1 %v2986_v1 }
 0x913   :  { %v1134_v48 = vpop.f32.mrb[16].mxu1 }
 0x914   :  { %v1138_v49 = vadd.f32 %v1134_v48, %v1067_v46  ;;  %v2340_v50 = vpop.f32.mrb[17].mxu1 }
 0x916   :  { %2972 = vtanh.f32 %v1138_v49 }
 0x920   :  { %v2973_v52 = vpop.eup %2972 }
 0x921   :  { %1140 = vst.msk [vmem:[%s3713_s4 + $0x8] sm:$0xff] %vm281_vm3, %v2973_v52  ;;  %2374 = vmatmul.mubr.f32.vlgmr.msra.gmra.mrb[18].mxu0 %v2973_v52 }
 0x922   :  { %1141 = vst.msk [vmem:[%s3713_s4 + $0x30] sm:$0xff] %vm183_vm2, %v2973_v52  ;;  %2841 = vmatpush3.bf16.msra.mxu0 %v3394_v43  ;;  %2443 = vmatprep.mubr.msk.f32.mxu0 %vm2987_vm0, %v2988_v2 }
 0x923   :  { %2842 = vmatprep.subr.bf16.mxu0 %v2986_v1 }
 0x926   :  { %2844 = vmatpush3.bf16.msra.mxu0 %v3406_v47 }
 0x927   :  { %2845 = vmatprep.subr.bf16.mxu0 %v2986_v1 }
 0x92a   :  { %2847 = vmatpush3.bf16.msra.mxu0 %v3419_v51 }
 0x92b   :  { %2848 = vmatprep.subr.bf16.mxu0 %v2986_v1 }
 0x92e   :  { %2850 = vmatpush3.bf16.msra.mxu0 %v3433_v55 }
 0x92f   :  { %2851 = vmatprep.subr.bf16.mxu0 %v2986_v1 }
 0x932   :  { %2853 = vmatpush3.bf16.msra.mxu0 %v3444_v58 }
 0x933   :  { %2854 = vmatprep.subr.bf16.mxu0 %v2986_v1 }
 0x936   :  { %2856 = vmatpush3.bf16.msra.mxu0 %v3454_v61 }
 0x937   :  { %2857 = vmatprep.subr.bf16.mxu0 %v2986_v1 }
 0x93a   :  { %2859 = vmatpush3.bf16.msra.mxu0 %v3464_v0 }
 0x93b   :  { %2860 = vmatprep.subr.bf16.mxu0 %v2986_v1 }
 0x93e   :  { %2862 = vmatpush3.bf16.msra.mxu0 %v3473_v5 }
 0x93f   :  { %2887 = vmatprep.subr.bf16.mxu0 %v2986_v1 }
 0x9f4   :  { %v1209_v54 = vpop.f32.mrb[18].mxu0 }
 0x9f5   :  { %v1213_v56 = vadd.f32 %v1209_v54, %v1142_v53  ;;  %v2375_v57 = vpop.f32.mrb[19].mxu0 }
 0x9f7   :  { %2974 = vtanh.f32 %v1213_v56 }
 0xa01   :  { %v2975_v59 = vpop.eup %2974 }
 0xa02   :  { %1215 = vst.msk [vmem:[%s3713_s4 + $0x10] sm:$0xff] %vm281_vm3, %v2975_v59  ;;  %2409 = vmatmul.mubr.f32.vlgmr.msra.gmra.mrb[18].mxu1 %v2975_v59 }
 0xa03   :  { %1216 = vst.msk [vmem:[%s3713_s4 + $0x28] sm:$0xff] %vm183_vm2, %v2975_v59  ;;  %2865 = vmatpush3.bf16.msra.mxu1 %v3394_v43  ;;  %2478 = vmatprep.mubr.msk.f32.mxu1 %vm2987_vm0, %v2988_v2 }
 0xa04   :  { %2866 = vmatprep.subr.bf16.mxu1 %v2986_v1 }
 0xa07   :  { %2868 = vmatpush3.bf16.msra.mxu1 %v3406_v47 }
 0xa08   :  { %2869 = vmatprep.subr.bf16.mxu1 %v2986_v1 }
 0xa0b   :  { %2871 = vmatpush3.bf16.msra.mxu1 %v3419_v51 }
 0xa0c   :  { %2872 = vmatprep.subr.bf16.mxu1 %v2986_v1 }
 0xa0f   :  { %2874 = vmatpush3.bf16.msra.mxu1 %v3433_v55 }
 0xa10   :  { %2875 = vmatprep.subr.bf16.mxu1 %v2986_v1 }
 0xa13   :  { %2877 = vmatpush3.bf16.msra.mxu1 %v3444_v58 }
 0xa14   :  { %2878 = vmatprep.subr.bf16.mxu1 %v2986_v1 }
 0xa17   :  { %2880 = vmatpush3.bf16.msra.mxu1 %v3454_v61 }
 0xa18   :  { %2881 = vmatprep.subr.bf16.mxu1 %v2986_v1 }
 0xa1b   :  { %2883 = vmatpush3.bf16.msra.mxu1 %v3464_v0 }
 0xa1c   :  { %2884 = vmatprep.subr.bf16.mxu1 %v2986_v1 }
 0xa1f   :  { %2886 = vmatpush3.bf16.msra.mxu1 %v3473_v5 }
 0xa20   :  { %2911 = vmatprep.subr.bf16.mxu1 %v2986_v1 }
 0xad5   :  { %v1284_v62 = vpop.f32.mrb[18].mxu1 }
 0xad6   :  { %v1288_v63 = vadd.f32 %v1284_v62, %v1217_v60  ;;  %v2410_v3 = vpop.f32.mrb[19].mxu1 }
 0xad8   :  { %2976 = vtanh.f32 %v1288_v63 }
 0xae2   :  { %v2977_v4 = vpop.eup %2976 }
 0xae3   :  { %1290 = vst.msk [vmem:[%s3713_s4 + $0x18] sm:$0xff] %vm281_vm3, %v2977_v4  ;;  %2444 = vmatmul.mubr.f32.vlgmr.msra.gmra.mrb[20].mxu0 %v2977_v4 }
 0xae4   :  { %1291 = vst.msk [vmem:[%s3713_s4 + $0x20] sm:$0xff] %vm183_vm2, %v2977_v4  ;;  %2889 = vmatpush3.bf16.msra.mxu0 %v3394_v43  ;;  %2513 = vmatprep.mubr.msk.f32.mxu0 %vm2987_vm0, %v2988_v2 }
 0xae5   :  { %2890 = vmatprep.subr.bf16.mxu0 %v2986_v1 }
 0xae8   :  { %2892 = vmatpush3.bf16.msra.mxu0 %v3406_v47 }
 0xae9   :  { %2893 = vmatprep.subr.bf16.mxu0 %v2986_v1 }
 0xaec   :  { %2895 = vmatpush3.bf16.msra.mxu0 %v3419_v51 }
 0xaed   :  { %2896 = vmatprep.subr.bf16.mxu0 %v2986_v1 }
 0xaf0   :  { %2898 = vmatpush3.bf16.msra.mxu0 %v3433_v55 }
 0xaf1   :  { %2899 = vmatprep.subr.bf16.mxu0 %v2986_v1 }
 0xaf4   :  { %2901 = vmatpush3.bf16.msra.mxu0 %v3444_v58 }
 0xaf5   :  { %2902 = vmatprep.subr.bf16.mxu0 %v2986_v1 }
 0xaf8   :  { %2904 = vmatpush3.bf16.msra.mxu0 %v3454_v61 }
 0xaf9   :  { %2905 = vmatprep.subr.bf16.mxu0 %v2986_v1 }
 0xafc   :  { %2907 = vmatpush3.bf16.msra.mxu0 %v3464_v0 }
 0xafd   :  { %2908 = vmatprep.subr.bf16.mxu0 %v2986_v1 }
 0xb00   :  { %2910 = vmatpush3.bf16.msra.mxu0 %v3473_v5 }
 0xbb6   :  { %v1359_v7 = vpop.f32.mrb[20].mxu0 }
 0xbb7   :  { %v1363_v9 = vadd.f32 %v1359_v7, %v1292_v6  ;;  %v2445_v10 = vpop.f32.mrb[21].mxu0 }
 0xbb9   :  { %2978 = vtanh.f32 %v1363_v9 }
 0xbc3   :  { %v2979_v12 = vpop.eup %2978 }
 0xbc4   :  { %1365 = vst.msk [vmem:[%s3713_s4 + $0x20] sm:$0xff] %vm281_vm3, %v2979_v12  ;;  %2479 = vmatmul.mubr.f32.vlgmr.msra.gmra.mrb[20].mxu1 %v2979_v12 }
 0xbc5   :  { %1366 = vst.msk [vmem:[%s3713_s4 + $0x18] sm:$0xff] %vm183_vm2, %v2979_v12  ;;  %2913 = vmatpush3.bf16.msra.mxu1 %v3394_v43  ;;  %2548 = vmatprep.mubr.msk.f32.mxu1 %vm2987_vm0, %v2988_v2  ;;  %v1367_v2 = vld [vmem:[#allocation2 + $0x28] sm:$0xff] }
 0xbc6   :  { %2914 = vmatprep.subr.bf16.mxu1 %v2986_v1 }
 0xbc9   :  { %2916 = vmatpush3.bf16.msra.mxu1 %v3406_v47 }
 0xbca   :  { %2917 = vmatprep.subr.bf16.mxu1 %v2986_v1 }
 0xbcd   :  { %2919 = vmatpush3.bf16.msra.mxu1 %v3419_v51 }
 0xbce   :  { %2920 = vmatprep.subr.bf16.mxu1 %v2986_v1 }
 0xbd1   :  { %2922 = vmatpush3.bf16.msra.mxu1 %v3433_v55 }
 0xbd2   :  { %2923 = vmatprep.subr.bf16.mxu1 %v2986_v1 }
 0xbd5   :  { %2925 = vmatpush3.bf16.msra.mxu1 %v3444_v58 }
 0xbd6   :  { %2926 = vmatprep.subr.bf16.mxu1 %v2986_v1 }
 0xbd9   :  { %2928 = vmatpush3.bf16.msra.mxu1 %v3454_v61 }
 0xbda   :  { %2929 = vmatprep.subr.bf16.mxu1 %v2986_v1 }
 0xbdd   :  { %2931 = vmatpush3.bf16.msra.mxu1 %v3464_v0 }
 0xbde   :  { %2932 = vmatprep.subr.bf16.mxu1 %v2986_v1  ;;  %v1442_v1 = vld [vmem:[#allocation2 + $0x30] sm:$0xff] }
 0xbe1   :  { %2934 = vmatpush3.bf16.msra.mxu1 %v3473_v5 }
 0xc97   :  { %v1434_v43 = vpop.f32.mrb[20].mxu1 }
 0xc98   :  { %v1438_v47 = vadd.f32 %v1434_v43, %v1367_v2  ;;  %v2480_v51 = vpop.f32.mrb[21].mxu1 }
 0xc9a   :  { %2980 = vtanh.f32 %v1438_v47 }
 0xca4   :  { %v2981_v55 = vpop.eup %2980 }
 0xca5   :  { %1440 = vst.msk [vmem:[%s3713_s4 + $0x28] sm:$0xff] %vm281_vm3, %v2981_v55  ;;  %2514 = vmatmul.mubr.f32.vlgmr.msra.gmra.mrb[22].mxu0 %v2981_v55 }
 0xca6   :  { %1441 = vst.msk [vmem:[%s3713_s4 + $0x10] sm:$0xff] %vm183_vm2, %v2981_v55 }
 0xd78   :  { %v1509_v58 = vpop.f32.mrb[22].mxu0 }
 0xd79   :  { %v1513_v61 = vadd.f32 %v1509_v58, %v1442_v1  ;;  %v2515_v0 = vpop.f32.mrb[23].mxu0 }
 0xd7b   :  { %2982 = vtanh.f32 %v1513_v61 }
 0xd85   :  { %v2983_v5 = vpop.eup %2982 }
 0xd86   :  { %1515 = vst.msk [vmem:[%s3713_s4 + $0x30] sm:$0xff] %vm281_vm3, %v2983_v5  ;;  %2549 = vmatmul.mubr.f32.vlgmr.msra.gmra.mrb[22].mxu1 %v2983_v5 }
 0xd87   :  { %1516 = vst.msk [vmem:[%s3713_s4 + $0x8] sm:$0xff] %vm183_vm2, %v2983_v5 }
 0xe59   :  { %v1584_v14 = vpop.f32.mrb[22].mxu1 }
 0xe5a   :  { %v1588_v15 = vadd.f32 %v1584_v14, %v1517_v13  ;;  %v2550_v16 = vpop.f32.mrb[23].mxu1 }
 0xe5c   :  { %2984 = vtanh.f32 %v1588_v15 }
 0xe66   :  { %v2985_v17 = vpop.eup %2984 }
 0xe67   :  { %1590 = vst.msk [vmem:[%s3713_s4 + $0x38] sm:$0xff] %vm281_vm3, %v2985_v17 }
 0xe68   :  { %1591 = vst.msk [vmem:[%s3713_s4] sm:$0xff] %vm183_vm2, %v2985_v17 }

// kernel: temporal_nn_forward.3
= control target key start
LH: loop header
LB: loop body
LE: loop exit
PB: predicated region body
PF: predicated region fallthrough
CT: control target
= control target key end

     0   :  { %vm222_vm0 = vcmask 261120   ;;  %vm438_vm1 = vcmask 1043456   ;;  %vm327_vm2 = vcmask 130048   ;;  %vm425_vm3 = vcmask 64512   ;;  %s896_s1 = inlined_call_operand.vmem [shape: bf16[128,32], index: 1, kind: input, shape index: {}]   ;;  %s897_s0 = inlined_call_operand.vmem [shape: f32[64,128], index: 0, kind: input, shape index: {}]   ;;  %s898_s3 = inlined_call_operand.vmem [shape: bf16[32,16], index: 3, kind: input, shape index: {}]   ;;  %s899_s5 = inlined_call_operand.vmem [shape: bf16[16,8], index: 5, kind: input, shape index: {}]   ;;  %s900_s2 = inlined_call_operand.vmem [shape: f32[1,32], index: 2, kind: input, shape index: {}]   ;;  %s901_s7 = inlined_call_operand.vmem [shape: bf16[8,128], index: 7, kind: input, shape index: {}]   ;;  %s902_s4 = inlined_call_operand.vmem [shape: f32[1,16], index: 4, kind: input, shape index: {}]   ;;  %s903_s6 = inlined_call_operand.vmem [shape: f32[1,8], index: 6, kind: input, shape index: {}]   ;;  %s904_s8 = inlined_call_operand.vmem [shape: f32[1,128], index: 8, kind: input, shape index: {}]   ;;  %s905_s10 = inlined_call_operand.vmem [shape: f32[1,128], index: 10, kind: input, shape index: {}]   ;;  %s906_s9 = inlined_call_operand.vmem [shape: f32[1,128], index: 9, kind: input, shape index: {}]   ;;  %s907_s11 = inlined_call_operand.vmem [shape: f32[64,128], index: 11, kind: output, shape index: {}]  }
   0x1   :  { %v695_v0 = vld [vmem:[%s896_s1] sm:$0xff]   ;;  %v696_v1 = vld [vmem:[%s896_s1 + $0x8] sm:$0xff]   ;;  %v697_v2 = vld [vmem:[%s896_s1 + $0x10] sm:$0xff]  }
   0x2   :  { %638 = vmatprep.subr.bf16.mxu0 %v695_v0  ;;  %v698_v3 = vld [vmem:[%s896_s1 + $0x18] sm:$0xff]   ;;  %v39_v4 = vld [vmem:[%s897_s0] sm:$0xff]  ;;  %v40_v5 = vld [vmem:[%s897_s0 + $0x8] sm:$0xff] }
   0x3   :  { %639 = vmatpush3.bf16.msra.mxu0 %v695_v0  ;;  %v47_v6 = vpack.c.bf16 %v40_v5, %v39_v4  ;;  %v699_v7 = vld [vmem:[%s896_s1 + $0x20] sm:$0xff]   ;;  %v700_v8 = vld [vmem:[%s896_s1 + $0x28] sm:$0xff]   ;;  %v701_v9 = vld [vmem:[%s896_s1 + $0x30] sm:$0xff]  }
   0x4   :  { %640 = vmatprep.subr.bf16.mxu0 %v696_v1  ;;  %v702_v10 = vld [vmem:[%s896_s1 + $0x38] sm:$0xff]   ;;  %v41_v11 = vld [vmem:[%s897_s0 + $0x10] sm:$0xff]  ;;  %v43_v13 = vld [vmem:[%s897_s0 + $0x20] sm:$0xff] }
   0x5   :  { %654 = vmatprep.mubr.bf16.mxu0 %v47_v6  ;;  %v42_v12 = vld [vmem:[%s897_s0 + $0x18] sm:$0xff]  ;;  %v44_v14 = vld [vmem:[%s897_s0 + $0x28] sm:$0xff]  ;;  %v45_v17 = vld [vmem:[%s897_s0 + $0x30] sm:$0xff] }
   0x6   :  { %v48_v15 = vpack.c.bf16 %v42_v12, %v41_v11  ;;  %v49_v16 = vpack.c.bf16 %v44_v14, %v43_v13  ;;  %v46_v18 = vld [vmem:[%s897_s0 + $0x38] sm:$0xff]  ;;  %v703_v20 = vld [vmem:[%s898_s3] sm:$0xff]   ;;  %v704_v21 = vld [vmem:[%s898_s3 + $0x8] sm:$0xff]  }
   0x7   :  { %641 = vmatpush3.bf16.msra.mxu0 %v696_v1  ;;  %v50_v19 = vpack.c.bf16 %v46_v18, %v45_v17  ;;  %662 = vmatprep.subr.bf16.mxu1 %v703_v20  ;;  %v705_v22 = vld [vmem:[%s899_s5] sm:$0xff]  }
   0x8   :  { %642 = vmatprep.subr.bf16.mxu0 %v697_v2  ;;  %663 = vmatpush3.bf16.msra.mxu1 %v703_v20  ;;  %v581_v23 = vld [vmem:[%s900_s2] ss:$0 sm:$0xff] }
   0x9   :  { %664 = vmatprep.subr.bf16.mxu1 %v704_v21  ;;  %v417_v52 = vld [vmem:[%s901_s7] sm:$0xf] }
   0xa   :  { %v440_v53 = vsel %vm438_vm1, %v417_v52, 0  ;;  %v590_v54 = vld [vmem:[%s902_s4] ss:$0 sm:$0xff] }
   0xb   :  { %643 = vmatpush3.bf16.msra.mxu0 %v697_v2 }
   0xc   :  { %644 = vmatprep.subr.bf16.mxu0 %v698_v3  ;;  %665 = vmatpush3.bf16.msra.mxu1 %v704_v21 }
   0xd   :  { %674 = vmatprep.subr.bf16.mxu1 %v705_v22 }
   0xf   :  { %645 = vmatpush3.bf16.msra.mxu0 %v698_v3 }
  0x10   :  { %646 = vmatprep.subr.bf16.mxu0 %v699_v7 }
  0x13   :  { %647 = vmatpush3.bf16.msra.mxu0 %v699_v7 }
  0x14   :  { %648 = vmatprep.subr.bf16.mxu0 %v700_v8 }
  0x17   :  { %649 = vmatpush3.bf16.msra.mxu0 %v700_v8 }
  0x18   :  { %650 = vmatprep.subr.bf16.mxu0 %v701_v9 }
  0x1b   :  { %651 = vmatpush3.bf16.msra.mxu0 %v701_v9 }
  0x1c   :  { %652 = vmatprep.subr.bf16.mxu0 %v702_v10 }
  0x1f   :  { %653 = vmatpush3.bf16.msra.mxu0 %v702_v10 }
  0x22   :  { %655 = vmatmul.mubr.bf16.vlgmr.msra.gmra.mrb[0].mxu0 %v48_v15 }
  0x23   :  { %658 = vmatprep.mubr.bf16.mxu0 %v49_v16 }
  0x2a   :  { %659 = vmatmul.mubr.bf16.gmra.mrb[4].mxu0 %v50_v19  ;;  %v597_v19 = vld [vmem:[%s903_s6] ss:$0 sm:$0xff] }
  0xf5   :  { %v656_v24 = vpop.f32.mrb[0].mxu0 }
  0xf6   :  { %v165_v25 = vadd.f32 %v656_v24, %v581_v23  ;;  %v156_v26 = vpop.f32.mrb[1].mxu0 }
  0xf7   :  { %v157_v27 = vadd.f32 %v581_v23, %v156_v26  ;;  %v657_v28 = vpop.f32.mrb[2].mxu0 }
  0xf8   :  { %v168_v29 = vadd.f32 %v657_v28, %v581_v23  ;;  %v159_v30 = vpop.f32.mrb[3].mxu0  ;;  %v189_v32 = vmax.f32 %v165_v25, 0.0 }
  0xf9   :  { %v160_v31 = vadd.f32 %v581_v23, %v159_v30  ;;  %v187_v34 = vmax.f32 %v157_v27, 0.0 }
  0xfa   :  { %v190_v33 = vmax.f32 %v168_v29, 0.0 }
  0xfb   :  { %v188_v35 = vmax.f32 %v160_v31, 0.0 }
  0xfc   :  { %v196_v36 = vpack.c.bf16 %v190_v33, %v189_v32 }
  0xfd   :  { %v660_v37 = vpop.f32.mrb[4].mxu0  ;;  %v195_v38 = vpack.c.bf16 %v188_v35, %v187_v34 }
  0xfe   :  { %v181_v39 = vadd.f32 %v660_v37, %v581_v23  ;;  %v172_v40 = vpop.f32.mrb[5].mxu0 }
  0xff   :  { %v173_v41 = vadd.f32 %v581_v23, %v172_v40  ;;  %v661_v42 = vpop.f32.mrb[6].mxu0  ;;  %666 = vmatprep.mubr.msk.bf16.mxu1 %vm222_vm0, %v195_v38 }
 0x100   :  { %v184_v43 = vadd.f32 %v661_v42, %v581_v23  ;;  %v175_v44 = vpop.f32.mrb[7].mxu0  ;;  %667 = vmatmul.mubr.msk.bf16.vlgmr.msra.gmra.mrb[0].mxu1 %vm222_vm0, %v196_v36  ;;  %v193_v46 = vmax.f32 %v181_v39, 0.0 }
 0x101   :  { %v176_v45 = vadd.f32 %v581_v23, %v175_v44  ;;  %675 = vmatpush3.bf16.msra.mxu1 %v705_v22  ;;  %v191_v48 = vmax.f32 %v173_v41, 0.0 }
 0x102   :  { %v194_v47 = vmax.f32 %v184_v43, 0.0  ;;  %694 = vmatprep.subr.msk.bf16.mxu1 %vm438_vm1, %v417_v52 }
 0x103   :  { %v192_v49 = vmax.f32 %v176_v45, 0.0 }
 0x104   :  { %v198_v50 = vpack.c.bf16 %v194_v47, %v193_v46 }
 0x105   :  { %v197_v51 = vpack.c.bf16 %v192_v49, %v191_v48  ;;  %v603_v48 = vld [vmem:[%s904_s8] ss:$0 sm:$0xff] }
 0x107   :  { %670 = vmatprep.mubr.msk.bf16.mxu1 %vm222_vm0, %v197_v51 }
 0x108   :  { %671 = vmatmul.mubr.msk.bf16.gmra.mrb[4].mxu1 %vm222_vm0, %v198_v50 }
 0x1d3   :  { %v668_v55 = vpop.f32.mrb[0].mxu1 }
 0x1d4   :  { %v278_v56 = vadd.f32 %v668_v55, %v590_v54  ;;  %v269_v57 = vpop.f32.mrb[1].mxu1 }
 0x1d5   :  { %v270_v58 = vadd.f32 %v590_v54, %v269_v57  ;;  %v669_v59 = vpop.f32.mrb[2].mxu1 }
 0x1d6   :  { %v281_v60 = vadd.f32 %v669_v59, %v590_v54  ;;  %v272_v61 = vpop.f32.mrb[3].mxu1  ;;  %v302_v63 = vmax.f32 %v278_v56, 0.0 }
 0x1d7   :  { %v273_v62 = vadd.f32 %v590_v54, %v272_v61  ;;  %v300_v1 = vmax.f32 %v270_v58, 0.0 }
 0x1d8   :  { %v303_v0 = vmax.f32 %v281_v60, 0.0 }
 0x1d9   :  { %v301_v2 = vmax.f32 %v273_v62, 0.0 }
 0x1da   :  { %v309_v3 = vpack.c.bf16 %v303_v0, %v302_v63 }
 0x1db   :  { %v308_v4 = vpack.c.bf16 %v301_v2, %v300_v1  ;;  %v672_v5 = vpop.f32.mrb[4].mxu1 }
 0x1dc   :  { %v294_v6 = vadd.f32 %v672_v5, %v590_v54  ;;  %v285_v7 = vpop.f32.mrb[5].mxu1 }
 0x1dd   :  { %v286_v8 = vadd.f32 %v590_v54, %v285_v7  ;;  %v673_v9 = vpop.f32.mrb[6].mxu1  ;;  %676 = vmatprep.mubr.msk.bf16.mxu1 %vm327_vm2, %v308_v4 }
 0x1de   :  { %v297_v10 = vadd.f32 %v673_v9, %v590_v54  ;;  %v288_v11 = vpop.f32.mrb[7].mxu1  ;;  %677 = vmatmul.mubr.msk.bf16.vlgmr.msra.gmra.mrb[8].mxu1 %vm327_vm2, %v309_v3  ;;  %v306_v13 = vmax.f32 %v294_v6, 0.0 }
 0x1df   :  { %v289_v12 = vadd.f32 %v590_v54, %v288_v11  ;;  %685 = vmatpush3.bf16.msra.mxu1 %v440_v53  ;;  %v304_v15 = vmax.f32 %v286_v8, 0.0 }
 0x1e0   :  { %v307_v14 = vmax.f32 %v297_v10, 0.0 }
 0x1e1   :  { %v305_v16 = vmax.f32 %v289_v12, 0.0 }
 0x1e2   :  { %v311_v17 = vpack.c.bf16 %v307_v14, %v306_v13  ;;  %v608_v13 = vld [vmem:[%s905_s10] ss:$0 sm:$0xff] }
 0x1e3   :  { %v310_v18 = vpack.c.bf16 %v305_v16, %v304_v15 }
 0x1e5   :  { %680 = vmatprep.mubr.msk.bf16.mxu1 %vm327_vm2, %v310_v18  ;;  %v609_v18 = vld [vmem:[%s906_s9] ss:$0 sm:$0xff] }
 0x1e6   :  { %681 = vmatmul.mubr.msk.bf16.gmra.mrb[12].mxu1 %vm327_vm2, %v311_v17 }
 0x2b1   :  { %v678_v20 = vpop.f32.mrb[8].mxu1 }
 0x2b2   :  { %v383_v21 = vadd.f32 %v678_v20, %v597_v19  ;;  %v374_v22 = vpop.f32.mrb[9].mxu1 }
 0x2b3   :  { %v375_v23 = vadd.f32 %v597_v19, %v374_v22  ;;  %v679_v24 = vpop.f32.mrb[10].mxu1 }
 0x2b4   :  { %v386_v25 = vadd.f32 %v679_v24, %v597_v19  ;;  %v377_v26 = vpop.f32.mrb[11].mxu1  ;;  %v407_v28 = vmax.f32 %v383_v21, 0.0 }
 0x2b5   :  { %v378_v27 = vadd.f32 %v597_v19, %v377_v26  ;;  %v405_v30 = vmax.f32 %v375_v23, 0.0 }
 0x2b6   :  { %v408_v29 = vmax.f32 %v386_v25, 0.0 }
 0x2b7   :  { %v406_v31 = vmax.f32 %v378_v27, 0.0 }
 0x2b8   :  { %v414_v32 = vpack.c.bf16 %v408_v29, %v407_v28 }
 0x2b9   :  { %v413_v33 = vpack.c.bf16 %v406_v31, %v405_v30  ;;  %v682_v34 = vpop.f32.mrb[12].mxu1 }
 0x2ba   :  { %v399_v35 = vadd.f32 %v682_v34, %v597_v19  ;;  %v390_v36 = vpop.f32.mrb[13].mxu1 }
 0x2bb   :  { %v391_v37 = vadd.f32 %v597_v19, %v390_v36  ;;  %v683_v38 = vpop.f32.mrb[14].mxu1  ;;  %686 = vmatprep.mubr.msk.bf16.mxu1 %vm425_vm3, %v413_v33 }
 0x2bc   :  { %v402_v39 = vadd.f32 %v683_v38, %v597_v19  ;;  %v393_v40 = vpop.f32.mrb[15].mxu1  ;;  %687 = vmatmul.mubr.msk.bf16.vlgmr.msra.gmra.mrb[16].mxu1 %vm425_vm3, %v414_v32  ;;  %v411_v42 = vmax.f32 %v399_v35, 0.0 }
 0x2bd   :  { %v394_v41 = vadd.f32 %v597_v19, %v393_v40  ;;  %v409_v44 = vmax.f32 %v391_v37, 0.0 }
 0x2be   :  { %v412_v43 = vmax.f32 %v402_v39, 0.0 }
 0x2bf   :  { %v410_v45 = vmax.f32 %v394_v41, 0.0 }
 0x2c0   :  { %v416_v46 = vpack.c.bf16 %v412_v43, %v411_v42 }
 0x2c1   :  { %v415_v47 = vpack.c.bf16 %v410_v45, %v409_v44 }
 0x2c3   :  { %690 = vmatprep.mubr.msk.bf16.mxu1 %vm425_vm3, %v415_v47 }
 0x2c4   :  { %691 = vmatmul.mubr.msk.bf16.gmra.mrb[20].mxu1 %vm425_vm3, %v416_v46 }
 0x38f   :  { %v688_v49 = vpop.f32.mrb[16].mxu1 }
 0x390   :  { %v485_v50 = vadd.f32 %v688_v49, %v603_v48  ;;  %v476_v51 = vpop.f32.mrb[17].mxu1 }
 0x391   :  { %v477_v52 = vadd.f32 %v603_v48, %v476_v51  ;;  %v689_v53 = vpop.f32.mrb[18].mxu1 }
 0x392   :  { %v509_v54 = vmul.f32 0.5, %v485_v50  ;;  %v488_v55 = vadd.f32 %v689_v53, %v603_v48  ;;  %v479_v56 = vpop.f32.mrb[19].mxu1 }
 0x393   :  { %v507_v57 = vmul.f32 0.5, %v477_v52  ;;  %v480_v58 = vadd.f32 %v603_v48, %v479_v56 }
 0x394   :  { %706 = vtanh.f32 %v509_v54  ;;  %v510_v59 = vmul.f32 0.5, %v488_v55 }
 0x395   :  { %708 = vtanh.f32 %v507_v57  ;;  %v508_v60 = vmul.f32 0.5, %v480_v58 }
 0x396   :  { %710 = vtanh.f32 %v510_v59 }
 0x397   :  { %712 = vtanh.f32 %v508_v60  ;;  %v692_v61 = vpop.f32.mrb[20].mxu1 }
 0x398   :  { %v501_v62 = vadd.f32 %v692_v61, %v603_v48  ;;  %v492_v63 = vpop.f32.mrb[21].mxu1 }
 0x399   :  { %v493_v0 = vadd.f32 %v603_v48, %v492_v63  ;;  %v693_v1 = vpop.f32.mrb[22].mxu1 }
 0x39a   :  { %v513_v2 = vmul.f32 0.5, %v501_v62  ;;  %v504_v3 = vadd.f32 %v693_v1, %v603_v48  ;;  %v495_v4 = vpop.f32.mrb[23].mxu1 }
 0x39b   :  { %v511_v5 = vmul.f32 0.5, %v493_v0  ;;  %v496_v6 = vadd.f32 %v603_v48, %v495_v4 }
 0x39c   :  { %714 = vtanh.f32 %v513_v2  ;;  %v514_v7 = vmul.f32 0.5, %v504_v3 }
 0x39d   :  { %716 = vtanh.f32 %v511_v5  ;;  %v512_v8 = vmul.f32 0.5, %v496_v6 }
 0x39e   :  { %v707_v9 = vpop.eup %706  ;;  %718 = vtanh.f32 %v514_v7 }
 0x39f   :  { %v709_v10 = vpop.eup %708  ;;  %v525_v11 = vadd.f32 1.0, %v707_v9  ;;  %720 = vtanh.f32 %v512_v8 }
 0x3a0   :  { %v711_v12 = vpop.eup %710  ;;  %v523_v14 = vadd.f32 1.0, %v709_v10 }
 0x3a1   :  { %v713_v15 = vpop.eup %712  ;;  %v533_v16 = vmul.f32 0.5, %v525_v11  ;;  %v526_v17 = vadd.f32 1.0, %v711_v12 }
 0x3a2   :  { %v531_v19 = vmul.f32 0.5, %v523_v14  ;;  %v524_v20 = vadd.f32 1.0, %v713_v15 }
 0x3a3   :  { %v549_v21 = vmul.f32 %v608_v13, %v533_v16  ;;  %v534_v22 = vmul.f32 0.5, %v526_v17 }
 0x3a4   :  { %v547_v23 = vmul.f32 %v608_v13, %v531_v19  ;;  %v532_v24 = vmul.f32 0.5, %v524_v20 }
 0x3a5   :  { %v563_v25 = vadd.f32 %v609_v18, %v549_v21  ;;  %v550_v26 = vmul.f32 %v608_v13, %v534_v22 }
 0x3a6   :  { %v715_v27 = vpop.eup %714  ;;  %v561_v28 = vadd.f32 %v609_v18, %v547_v23  ;;  %v548_v29 = vmul.f32 %v608_v13, %v532_v24 }
 0x3a7   :  { %v717_v30 = vpop.eup %716  ;;  %571 = vst [vmem:[%s907_s11 + $0x10] sm:$0xff] %v563_v25  ;;  %v564_v31 = vadd.f32 %v609_v18, %v550_v26  ;;  %v529_v32 = vadd.f32 1.0, %v715_v27 }
 0x3a8   :  { %v719_v33 = vpop.eup %718  ;;  %569 = vst [vmem:[%s907_s11] sm:$0xff] %v561_v28  ;;  %v562_v34 = vadd.f32 %v609_v18, %v548_v29  ;;  %v527_v35 = vadd.f32 1.0, %v717_v30 }
 0x3a9   :  { %v721_v36 = vpop.eup %720  ;;  %572 = vst [vmem:[%s907_s11 + $0x18] sm:$0xff] %v564_v31  ;;  %v537_v37 = vmul.f32 0.5, %v529_v32  ;;  %v530_v38 = vadd.f32 1.0, %v719_v33 }
 0x3aa   :  { %570 = vst [vmem:[%s907_s11 + $0x8] sm:$0xff] %v562_v34  ;;  %v535_v39 = vmul.f32 0.5, %v527_v35  ;;  %v528_v40 = vadd.f32 1.0, %v721_v36 }
 0x3ab   :  { %v553_v41 = vmul.f32 %v608_v13, %v537_v37  ;;  %v538_v42 = vmul.f32 0.5, %v530_v38 }
 0x3ac   :  { %v551_v43 = vmul.f32 %v608_v13, %v535_v39  ;;  %v536_v44 = vmul.f32 0.5, %v528_v40 }
 0x3ad   :  { %v567_v45 = vadd.f32 %v609_v18, %v553_v41  ;;  %v554_v46 = vmul.f32 %v608_v13, %v538_v42 }
 0x3ae   :  { %v565_v47 = vadd.f32 %v609_v18, %v551_v43  ;;  %v552_v48 = vmul.f32 %v608_v13, %v536_v44 }
 0x3af   :  { %575 = vst [vmem:[%s907_s11 + $0x30] sm:$0xff] %v567_v45  ;;  %v568_v49 = vadd.f32 %v609_v18, %v554_v46 }
 0x3b0   :  { %573 = vst [vmem:[%s907_s11 + $0x20] sm:$0xff] %v565_v47  ;;  %v566_v50 = vadd.f32 %v609_v18, %v552_v48 }
 0x3b1   :  { %576 = vst [vmem:[%s907_s11 + $0x38] sm:$0xff] %v568_v49 }
 0x3b2   :  { %574 = vst [vmem:[%s907_s11 + $0x28] sm:$0xff] %v566_v50 }

</bundles_post_ra>
